<compile_context>
chip_gen: v7x
topology: tpu7x:2x2x1
jax: 0.10.0
libtpu: 0.0.40
codegen_flags: <defaults>
</compile_context>

<pallas_src>
import functools
import math

import jax
import jax.numpy as jnp
from jax.experimental import pallas as pl
from jax.experimental.pallas import tpu as pltpu


# --------------------------- Fused decoder-stack kernel ----------------------

def _decoder_stack_kernel(x_ref, enc_ref, tbias_ref, sbias_ref,
                          w_in_ref, w_out_ref, vecs_ref, b1_ref,
                          vw_ref, vb_ref,
                          o_ref, h_scr, *, heads):
    E = x_ref.shape[-1]            # embed size
    F = b1_ref.shape[-1]           # feed-forward hidden size
    d = E // heads
    inv_scale = 1.0 / math.sqrt(float(E))
    layer = pl.program_id(1)

    # Load the embedded tokens into the persistent activation scratch at layer 0.
    @pl.when(layer == 0)
    def _():
        h_scr[...] = x_ref[...].astype(jnp.float32)

    x = h_scr[...]                 # [L, E] f32, resident across the layer axis
    enc = enc_ref[...]             # [S, E] bf16

    def rowvec(i):                 # [1, E] f32 slice of the packed vector slab
        return vecs_ref[i:i + 1, :]

    def layer_norm(v, g, b):
        # PyTorch nn.LayerNorm default eps=1e-5, stats in f32.
        mean = jnp.mean(v, axis=-1, keepdims=True)
        var = jnp.mean((v - mean) ** 2, axis=-1, keepdims=True)
        return (v - mean) * jax.lax.rsqrt(var + 1e-5) * g + b

    def attention(q, k, v, bias):
        # q: [Lq, E] f32, k/v: [Lk, E] f32, bias broadcastable to [Lq, Lk].
        ctx = []
        for h in range(heads):
            sl = slice(h * d, (h + 1) * d)
            qh = q[:, sl].astype(jnp.bfloat16)
            kh = k[:, sl].astype(jnp.bfloat16)
            vh = v[:, sl].astype(jnp.bfloat16)
            # energy = qh @ kh^T  (NT dot, no explicit transpose)
            e = jax.lax.dot_general(qh, kh, (((1,), (1,)), ((), ())),
                                    preferred_element_type=jnp.float32)
            e = e * inv_scale + bias
            m = jnp.max(e, axis=-1, keepdims=True)
            p = jnp.exp(e - m)
            a = p * pl.reciprocal(jnp.sum(p, axis=-1, keepdims=True),
                                  approx=True)
            ctx.append(jnp.dot(a.astype(jnp.bfloat16), vh,
                               preferred_element_type=jnp.float32))
        # Single concat + one fc_out matmul afterwards (no per-head accumulation).
        return jnp.concatenate(ctx, axis=-1)          # [Lq, E] f32

    # ---- masked self-attention + Add & LayerNorm -----------------------------
    x_b = x.astype(jnp.bfloat16)
    qkv = jnp.dot(x_b, w_in_ref[:, 0:3 * E],
                  preferred_element_type=jnp.float32)             # [L, 3E]
    ctx = attention(qkv[:, 0:E], qkv[:, E:2 * E], qkv[:, 2 * E:3 * E],
                    tbias_ref[...])
    attn = jnp.dot(ctx.astype(jnp.bfloat16), w_out_ref[0:E, :],
                   preferred_element_type=jnp.float32) + rowvec(0)
    query = layer_norm(attn + x, rowvec(1), rowvec(2))

    # ---- cross-attention (K/V = encoder output) + Add & LayerNorm ------------
    q_c = jnp.dot(query.astype(jnp.bfloat16), w_in_ref[:, 3 * E:4 * E],
                  preferred_element_type=jnp.float32)             # [L, E]
    kv_c = jnp.dot(enc, w_in_ref[:, 4 * E:6 * E],
                   preferred_element_type=jnp.float32)            # [S, 2E]
    ctx2 = attention(q_c, kv_c[:, 0:E], kv_c[:, E:2 * E], sbias_ref[...])
    attn2 = jnp.dot(ctx2.astype(jnp.bfloat16), w_out_ref[E:2 * E, :],
                    preferred_element_type=jnp.float32) + rowvec(3)
    x2 = layer_norm(attn2 + query, rowvec(4), rowvec(5))

    # ---- FFN (Linear -> ReLU -> Linear) + Add & LayerNorm --------------------
    h1 = jnp.dot(x2.astype(jnp.bfloat16), w_in_ref[:, 6 * E:6 * E + F],
                 preferred_element_type=jnp.float32) + b1_ref[...]
    h1 = jnp.maximum(h1, 0.0)
    ff = jnp.dot(h1.astype(jnp.bfloat16), w_out_ref[2 * E:2 * E + F, :],
                 preferred_element_type=jnp.float32) + rowvec(6)
    out = layer_norm(ff + x2, rowvec(7), rowvec(8))

    h_scr[...] = out

    # ---- fused lane-dense vocab projection on the last layer -----------------
    @pl.when(layer == pl.num_programs(1) - 1)
    def _():
        logits = jnp.dot(out.astype(jnp.bfloat16), vw_ref[...],
                         preferred_element_type=jnp.float32) + vb_ref[...]
        o_ref[...] = logits.astype(o_ref.dtype)


# --------------------------- One-time weight preparation ----------------------

def prepare_params(params, embed_size, heads):
    """Hoisted weight prep: block-diag fold, transpose to (in,out), bf16 casts,
    packing into layer-stacked slabs, vocab padding.  Runs once, outside jit."""
    E = embed_size
    eyeh = jnp.eye(heads, dtype=jnp.float32)

    def bd(w):                    # per-head [d,d] -> block-diagonal [E,E] (in,out)
        return jnp.kron(eyeh, w.T)

    w_in_l, w_out_l, vecs_l, b1_l = [], [], [], []
    for p in params["layers"]:
        sa, ca = p["self_attn"], p["cross_attn"]
        # input-side weight slab [E, 6E + F]:
        #   sa_q | sa_k | sa_v | ca_q | ca_k | ca_v | ff_w1
        w_in_l.append(jnp.concatenate(
            [bd(sa["wq"]), bd(sa["wk"]), bd(sa["wv"]),
             bd(ca["wq"]), bd(ca["wk"]), bd(ca["wv"]),
             p["ff_w1"].T], axis=1))
        # output-side weight slab [2E + F, E]: sa_fc | ca_fc | ff_w2 (row-stacked)
        w_out_l.append(jnp.concatenate(
            [sa["fc_w"].T, ca["fc_w"].T, p["ff_w2"].T], axis=0))
        # gain/bias slab [9, E]
        vecs_l.append(jnp.stack(
            [sa["fc_b"], p["norm_g"], p["norm_b"],
             ca["fc_b"], p["tb_norm1_g"], p["tb_norm1_b"],
             p["ff_b2"], p["tb_norm2_g"], p["tb_norm2_b"]], axis=0))
        b1_l.append(p["ff_b1"].reshape(1, -1))

    vocab = params["fc_out_w"].shape[0]
    vpad = ((vocab + 127) // 128) * 128
    vw = jnp.zeros((E, vpad), jnp.float32).at[:, :vocab].set(params["fc_out_w"].T)
    vb = jnp.zeros((1, vpad), jnp.float32).at[0, :vocab].set(params["fc_out_b"])

    return dict(
        word_emb=params["word_emb"].astype(jnp.float32),
        pos_emb=params["pos_emb"].astype(jnp.float32),
        w_in=jnp.stack(w_in_l).astype(jnp.bfloat16),     # [nl, E, 6E+F]
        w_out=jnp.stack(w_out_l).astype(jnp.bfloat16),   # [nl, 2E+F, E]
        vecs=jnp.stack(vecs_l).astype(jnp.float32),      # [nl, 9, E]
        b1=jnp.stack(b1_l).astype(jnp.float32),          # [nl, 1, F]
        vw=vw.astype(jnp.bfloat16),                      # [E, vpad]
        vb=vb,                                           # [1, vpad]
    )


# --------------------------- Model wrapper ------------------------------------

@functools.partial(jax.jit, static_argnames=("embed_size", "heads", "vocab"))
def decoder_forward(prep, tokens, encoder_out, src_mask, target_mask,
                    *, embed_size, heads, vocab):
    n, l = tokens.shape
    s = encoder_out.shape[1]
    e = embed_size
    nl = prep["w_in"].shape[0]
    f = prep["b1"].shape[-1]
    vpad = prep["vw"].shape[1]

    # Embeddings (gather) in plain JAX; dropout is identity in eval mode.
    h = prep["word_emb"][tokens] + prep["pos_emb"][jnp.arange(l)][None]
    x_in = h.astype(jnp.bfloat16)
    enc = encoder_out.astype(jnp.bfloat16)

    # Compact additive biases (0 = keep, -1e20 = masked).
    # target_mask is batch-broadcast ([1,L,L] or [L,L]); src_mask is a per-batch
    # key-padding mask broadcast over query positions ([N,1,S]).
    tbias = jnp.where(jnp.broadcast_to(target_mask, (1, l, l)) == 0,
                      jnp.float32(-1e20), jnp.float32(0.0))
    sbias = jnp.where(jnp.broadcast_to(src_mask, (n, 1, s)) == 0,
                      jnp.float32(-1e20), jnp.float32(0.0))

    kern = functools.partial(_decoder_stack_kernel, heads=heads)
    logits_pad = pl.pallas_call(
        kern,
        out_shape=jax.ShapeDtypeStruct((n, l, vpad), jnp.float32),
        grid=(n, nl),
        in_specs=[
            pl.BlockSpec((None, l, e), lambda i, j: (i, 0, 0)),          # x (bf16)
            pl.BlockSpec((None, s, e), lambda i, j: (i, 0, 0)),          # enc (bf16)
            pl.BlockSpec((None, l, l), lambda i, j: (0, 0, 0)),          # causal bias
            pl.BlockSpec((None, 1, s), lambda i, j: (i, 0, 0)),          # src bias
            pl.BlockSpec((None, e, 6 * e + f), lambda i, j: (j, 0, 0)),  # w_in slab
            pl.BlockSpec((None, 2 * e + f, e), lambda i, j: (j, 0, 0)),  # w_out slab
            pl.BlockSpec((None, 9, e), lambda i, j: (j, 0, 0)),          # vec slab
            pl.BlockSpec((None, 1, f), lambda i, j: (j, 0, 0)),          # ffn bias1
            pl.BlockSpec((e, vpad), lambda i, j: (0, 0)),                # vocab W
            pl.BlockSpec((1, vpad), lambda i, j: (0, 0)),                # vocab b
        ],
        out_specs=pl.BlockSpec((None, l, vpad), lambda i, j: (i, 0, 0)),
        scratch_shapes=[pltpu.VMEM((l, e), jnp.float32)],                # resident h
        compiler_params=pltpu.CompilerParams(
            dimension_semantics=("parallel", "arbitrary"),
            vmem_limit_bytes=32 * 1024 * 1024),
    )(x_in, enc, tbias, sbias, prep["w_in"], prep["w_out"], prep["vecs"],
      prep["b1"], prep["vw"], prep["vb"])

    return logits_pad[:, :, :vocab]


# --------------------------- Parameter init ----------------------------------

def _init_linear(key, out_f, in_f, bias=True):
    bound = 1.0 / math.sqrt(in_f)
    kw, kb = jax.random.split(key)
    w = jax.random.uniform(kw, (out_f, in_f), jnp.float32, -bound, bound)
    if not bias:
        return w
    b = jax.random.uniform(kb, (out_f,), jnp.float32, -bound, bound)
    return w, b


def _init_attention(key, embed, heads):
    d = embed // heads
    k1, k2, k3, k4 = jax.random.split(key, 4)
    fc_w, fc_b = _init_linear(k4, embed, embed)
    return dict(
        wq=_init_linear(k1, d, d, bias=False),
        wk=_init_linear(k2, d, d, bias=False),
        wv=_init_linear(k3, d, d, bias=False),
        fc_w=fc_w, fc_b=fc_b,
    )


def _init_decode_block(key, embed, heads, fwd_exp):
    k1, k2, k3, k4 = jax.random.split(key, 4)
    w1, b1 = _init_linear(k3, fwd_exp * embed, embed)
    w2, b2 = _init_linear(k4, embed, fwd_exp * embed)
    return dict(
        self_attn=_init_attention(k1, embed, heads),
        cross_attn=_init_attention(k2, embed, heads),
        norm_g=jnp.ones((embed,), jnp.float32),
        norm_b=jnp.zeros((embed,), jnp.float32),
        tb_norm1_g=jnp.ones((embed,), jnp.float32),
        tb_norm1_b=jnp.zeros((embed,), jnp.float32),
        tb_norm2_g=jnp.ones((embed,), jnp.float32),
        tb_norm2_b=jnp.zeros((embed,), jnp.float32),
        ff_w1=w1, ff_b1=b1, ff_w2=w2, ff_b2=b2,
    )


def init_params(key, vocab, embed, num_layers, heads, fwd_exp, max_len):
    keys = jax.random.split(key, 3 + num_layers)
    fc_w, fc_b = _init_linear(keys[2], vocab, embed)
    return dict(
        word_emb=jax.random.normal(keys[0], (vocab, embed), jnp.float32),
        pos_emb=jax.random.normal(keys[1], (max_len, embed), jnp.float32),
        layers=[_init_decode_block(keys[3 + i], embed, heads, fwd_exp)
                for i in range(num_layers)],
        fc_out_w=fc_w, fc_out_b=fc_b,
    )


# ------------------------------- Main -----------------------------------------

if __name__ == "__main__":
    VOCAB, EMBED, LAYERS, HEADS, FWD_EXP, MAX_LEN = 50, 32, 2, 4, 2, 16
    N, TGT_LEN, SRC_LEN = 2, 8, 8

    key = jax.random.PRNGKey(0)
    kp, kt, ke = jax.random.split(key, 3)

    params = init_params(kp, VOCAB, EMBED, LAYERS, HEADS, FWD_EXP, MAX_LEN)
    prep = prepare_params(params, EMBED, HEADS)        # one-time weight preparation

    tokens = jax.random.randint(kt, (N, TGT_LEN), 0, VOCAB)
    encoder_out = jax.random.normal(ke, (N, SRC_LEN, EMBED), jnp.float32)
    # src_mask: padding mask (all valid); target_mask: causal lower-triangular
    src_mask = jnp.ones((N, 1, SRC_LEN), jnp.int32)
    target_mask = jnp.tril(jnp.ones((TGT_LEN, TGT_LEN), jnp.int32))[None]

    out = decoder_forward(prep, tokens, encoder_out, src_mask, target_mask,
                          embed_size=EMBED, heads=HEADS, vocab=VOCAB)
    out = jax.block_until_ready(out)
    assert out.shape == (N, TGT_LEN, VOCAB) and out.dtype == jnp.float32
    assert bool(jnp.all(jnp.isfinite(out)))
    print("KERNEL_OK")
</pallas_src>

<mosaic_0001>
module attributes {stable_mosaic.version = 11 : i64} {
  func.func @_decoder_stack_kernel(%arg0: i32, %arg1: i32, %arg2: memref<1x8x32xbf16, #tpu.memory_space<vmem>>, %arg3: memref<1x8x32xbf16, #tpu.memory_space<vmem>>, %arg4: memref<1x8x8xf32, #tpu.memory_space<vmem>>, %arg5: memref<1x1x8xf32, #tpu.memory_space<vmem>>, %arg6: memref<1x32x256xbf16, #tpu.memory_space<vmem>>, %arg7: memref<1x128x32xbf16, #tpu.memory_space<vmem>>, %arg8: memref<1x9x32xf32, #tpu.memory_space<vmem>>, %arg9: memref<1x1x64xf32, #tpu.memory_space<vmem>>, %arg10: memref<32x128xbf16, #tpu.memory_space<vmem>>, %arg11: memref<1x128xf32, #tpu.memory_space<vmem>>, %arg12: memref<1x8x128xf32, #tpu.memory_space<vmem>>, %arg13: memref<8x32xf32, #tpu.memory_space<vmem>>) attributes {dimension_semantics = [#tpu.dimension_semantics<parallel>, #tpu.dimension_semantics<arbitrary>], iteration_bounds = array<i64: 2, 2>, scalar_prefetch = 0 : i64, scratch_operands = 1 : i64, tpu.core_type = #tpu.core_type<tc>, window_params = [{transform_indices = @transform_0, window_bounds = array<i64: 1, 8, 32>}, {transform_indices = @transform_1, window_bounds = array<i64: 1, 8, 32>}, {pipeline_mode = #tpu.pipeline_mode<synchronous>, transform_indices = @transform_2, window_bounds = array<i64: 1, 8, 8>}, {transform_indices = @transform_3, window_bounds = array<i64: 1, 1, 8>}, {transform_indices = @transform_4, window_bounds = array<i64: 1, 32, 256>}, {transform_indices = @transform_5, window_bounds = array<i64: 1, 128, 32>}, {transform_indices = @transform_6, window_bounds = array<i64: 1, 9, 32>}, {transform_indices = @transform_7, window_bounds = array<i64: 1, 1, 64>}, {pipeline_mode = #tpu.pipeline_mode<synchronous>, transform_indices = @transform_8, window_bounds = array<i64: 32, 128>}, {pipeline_mode = #tpu.pipeline_mode<synchronous>, transform_indices = @transform_9, window_bounds = array<i64: 1, 128>}, {transform_indices = @transform_10, window_bounds = array<i64: 1, 8, 128>}]} {
    %c0_i32 = arith.constant 0 : i32
    %0 = arith.cmpi eq, %arg1, %c0_i32 : i32
    %1 = arith.extui %0 : i1 to i32
    %c0_i32_0 = arith.constant 0 : i32
    %2 = arith.cmpi ne, %1, %c0_i32_0 : i32
    scf.if %2 {
      %c0_114 = arith.constant 0 : index
      %c0_115 = arith.constant 0 : index
      %c0_116 = arith.constant 0 : index
      %327 = vector.load %arg2[%c0_114, %c0_115, %c0_116] : memref<1x8x32xbf16, #tpu.memory_space<vmem>>, vector<1x8x32xbf16>
      %328 = vector.shape_cast %327 : vector<1x8x32xbf16> to vector<8x32xbf16>
      %329 = arith.extf %328 : vector<8x32xbf16> to vector<8x32xf32>
      %c0_117 = arith.constant 0 : index
      %c0_118 = arith.constant 0 : index
      %330 = vector.load %arg13[%c0_117, %c0_118] : memref<8x32xf32, #tpu.memory_space<vmem>>, vector<8x32xf32>
      tpu.vector_store %arg13[%c0_117, %c0_118], %329 {strides = array<i32>} : memref<8x32xf32, #tpu.memory_space<vmem>>, vector<8x32xf32>,
    } else {
    }
    %c0 = arith.constant 0 : index
    %c0_1 = arith.constant 0 : index
    %3 = vector.load %arg13[%c0, %c0_1] : memref<8x32xf32, #tpu.memory_space<vmem>>, vector<8x32xf32>
    %c0_2 = arith.constant 0 : index
    %c0_3 = arith.constant 0 : index
    %c0_4 = arith.constant 0 : index
    %4 = vector.load %arg3[%c0_2, %c0_3, %c0_4] : memref<1x8x32xbf16, #tpu.memory_space<vmem>>, vector<1x8x32xbf16>
    %5 = vector.shape_cast %4 : vector<1x8x32xbf16> to vector<8x32xbf16>
    %6 = arith.truncf %3 : vector<8x32xf32> to vector<8x32xbf16>
    %c0_5 = arith.constant 0 : index
    %c0_6 = arith.constant 0 : index
    %c0_7 = arith.constant 0 : index
    %7 = vector.load %arg6[%c0_5, %c0_6, %c0_7] : memref<1x32x256xbf16, #tpu.memory_space<vmem>>, vector<1x32x96xbf16>
    %8 = vector.shape_cast %7 : vector<1x32x96xbf16> to vector<32x96xbf16>
    %cst = arith.constant dense<0.000000e+00> : vector<8x96xf32>
    %9 = tpu.matmul %6, %8, %cst {dimension_numbers = #tpu.dot_dimension_numbers<[1], [0], [0], [1], [0, 0, 1, 1], [], []>} : vector<8x32xbf16>, vector<32x96xbf16>, vector<8x96xf32> -> vector<8x96xf32>
    %10 = vector.extract_strided_slice %9 {offsets = [0, 0], sizes = [8, 32], strides = [1, 1]} : vector<8x96xf32> to vector<8x32xf32>
    %11 = vector.extract_strided_slice %9 {offsets = [0, 32], sizes = [8, 32], strides = [1, 1]} : vector<8x96xf32> to vector<8x32xf32>
    %12 = vector.extract_strided_slice %9 {offsets = [0, 64], sizes = [8, 32], strides = [1, 1]} : vector<8x96xf32> to vector<8x32xf32>
    %c0_8 = arith.constant 0 : index
    %c0_9 = arith.constant 0 : index
    %c0_10 = arith.constant 0 : index
    %13 = vector.load %arg4[%c0_8, %c0_9, %c0_10] : memref<1x8x8xf32, #tpu.memory_space<vmem>>, vector<1x8x8xf32>
    %14 = vector.shape_cast %13 : vector<1x8x8xf32> to vector<8x8xf32>
    %15 = vector.extract_strided_slice %10 {offsets = [0, 0], sizes = [8, 8], strides = [1, 1]} : vector<8x32xf32> to vector<8x8xf32>
    %16 = arith.truncf %15 : vector<8x8xf32> to vector<8x8xbf16>
    %17 = vector.extract_strided_slice %11 {offsets = [0, 0], sizes = [8, 8], strides = [1, 1]} : vector<8x32xf32> to vector<8x8xf32>
    %18 = arith.truncf %17 : vector<8x8xf32> to vector<8x8xbf16>
    %19 = vector.extract_strided_slice %12 {offsets = [0, 0], sizes = [8, 8], strides = [1, 1]} : vector<8x32xf32> to vector<8x8xf32>
    %20 = arith.truncf %19 : vector<8x8xf32> to vector<8x8xbf16>
    %cst_11 = arith.constant dense<0.000000e+00> : vector<8x8xf32>
    %21 = tpu.matmul %16, %18, %cst_11 {dimension_numbers = #tpu.dot_dimension_numbers<[1], [1], [0], [0], [0, 0, 1, 0], [], []>} : vector<8x8xbf16>, vector<8x8xbf16>, vector<8x8xf32> -> vector<8x8xf32>
    %cst_12 = arith.constant 0.176776692 : f32
    %22 = vector.broadcast %cst_12 : f32 to vector<8x8xf32>
    %23 = arith.mulf %21, %22 : vector<8x8xf32>
    %24 = arith.addf %23, %14 : vector<8x8xf32>
    %cst_13 = arith.constant dense<0xFF800000> : vector<8xf32>
    %25 = vector.multi_reduction <maximumf>, %24, %cst_13 [1] : vector<8x8xf32> to vector<8xf32>
    %26 = vector.shape_cast %25 : vector<8xf32> to vector<8x1xf32>
    %27 = vector.broadcast %26 : vector<8x1xf32> to vector<8x8xf32>
    %28 = arith.subf %24, %27 : vector<8x8xf32>
    %29 = math.exp %28 : vector<8x8xf32>
    %cst_14 = arith.constant dense<0.000000e+00> : vector<8xf32>
    %30 = vector.multi_reduction <add>, %29, %cst_14 [1] : vector<8x8xf32> to vector<8xf32>
    %31 = vector.shape_cast %30 : vector<8xf32> to vector<8x1xf32>
    %32 = tpu.reciprocal %31 {approx = true} : vector<8x1xf32> -> vector<8x1xf32>
    %33 = vector.broadcast %32 : vector<8x1xf32> to vector<8x8xf32>
    %34 = arith.mulf %29, %33 : vector<8x8xf32>
    %35 = arith.truncf %34 : vector<8x8xf32> to vector<8x8xbf16>
    %cst_15 = arith.constant dense<0.000000e+00> : vector<8x8xf32>
    %36 = tpu.matmul %35, %20, %cst_15 {dimension_numbers = #tpu.dot_dimension_numbers<[1], [0], [0], [1], [0, 0, 1, 1], [], []>} : vector<8x8xbf16>, vector<8x8xbf16>, vector<8x8xf32> -> vector<8x8xf32>
    %37 = vector.extract_strided_slice %10 {offsets = [0, 8], sizes = [8, 8], strides = [1, 1]} : vector<8x32xf32> to vector<8x8xf32>
    %38 = arith.truncf %37 : vector<8x8xf32> to vector<8x8xbf16>
    %39 = vector.extract_strided_slice %11 {offsets = [0, 8], sizes = [8, 8], strides = [1, 1]} : vector<8x32xf32> to vector<8x8xf32>
    %40 = arith.truncf %39 : vector<8x8xf32> to vector<8x8xbf16>
    %41 = vector.extract_strided_slice %12 {offsets = [0, 8], sizes = [8, 8], strides = [1, 1]} : vector<8x32xf32> to vector<8x8xf32>
    %42 = arith.truncf %41 : vector<8x8xf32> to vector<8x8xbf16>
    %cst_16 = arith.constant dense<0.000000e+00> : vector<8x8xf32>
    %43 = tpu.matmul %38, %40, %cst_16 {dimension_numbers = #tpu.dot_dimension_numbers<[1], [1], [0], [0], [0, 0, 1, 0], [], []>} : vector<8x8xbf16>, vector<8x8xbf16>, vector<8x8xf32> -> vector<8x8xf32>
    %cst_17 = arith.constant 0.176776692 : f32
    %44 = vector.broadcast %cst_17 : f32 to vector<8x8xf32>
    %45 = arith.mulf %43, %44 : vector<8x8xf32>
    %46 = arith.addf %45, %14 : vector<8x8xf32>
    %cst_18 = arith.constant dense<0xFF800000> : vector<8xf32>
    %47 = vector.multi_reduction <maximumf>, %46, %cst_18 [1] : vector<8x8xf32> to vector<8xf32>
    %48 = vector.shape_cast %47 : vector<8xf32> to vector<8x1xf32>
    %49 = vector.broadcast %48 : vector<8x1xf32> to vector<8x8xf32>
    %50 = arith.subf %46, %49 : vector<8x8xf32>
    %51 = math.exp %50 : vector<8x8xf32>
    %cst_19 = arith.constant dense<0.000000e+00> : vector<8xf32>
    %52 = vector.multi_reduction <add>, %51, %cst_19 [1] : vector<8x8xf32> to vector<8xf32>
    %53 = vector.shape_cast %52 : vector<8xf32> to vector<8x1xf32>
    %54 = tpu.reciprocal %53 {approx = true} : vector<8x1xf32> -> vector<8x1xf32>
    %55 = vector.broadcast %54 : vector<8x1xf32> to vector<8x8xf32>
    %56 = arith.mulf %51, %55 : vector<8x8xf32>
    %57 = arith.truncf %56 : vector<8x8xf32> to vector<8x8xbf16>
    %cst_20 = arith.constant dense<0.000000e+00> : vector<8x8xf32>
    %58 = tpu.matmul %57, %42, %cst_20 {dimension_numbers = #tpu.dot_dimension_numbers<[1], [0], [0], [1], [0, 0, 1, 1], [], []>} : vector<8x8xbf16>, vector<8x8xbf16>, vector<8x8xf32> -> vector<8x8xf32>
    %59 = vector.extract_strided_slice %10 {offsets = [0, 16], sizes = [8, 8], strides = [1, 1]} : vector<8x32xf32> to vector<8x8xf32>
    %60 = arith.truncf %59 : vector<8x8xf32> to vector<8x8xbf16>
    %61 = vector.extract_strided_slice %11 {offsets = [0, 16], sizes = [8, 8], strides = [1, 1]} : vector<8x32xf32> to vector<8x8xf32>
    %62 = arith.truncf %61 : vector<8x8xf32> to vector<8x8xbf16>
    %63 = vector.extract_strided_slice %12 {offsets = [0, 16], sizes = [8, 8], strides = [1, 1]} : vector<8x32xf32> to vector<8x8xf32>
    %64 = arith.truncf %63 : vector<8x8xf32> to vector<8x8xbf16>
    %cst_21 = arith.constant dense<0.000000e+00> : vector<8x8xf32>
    %65 = tpu.matmul %60, %62, %cst_21 {dimension_numbers = #tpu.dot_dimension_numbers<[1], [1], [0], [0], [0, 0, 1, 0], [], []>} : vector<8x8xbf16>, vector<8x8xbf16>, vector<8x8xf32> -> vector<8x8xf32>
    %cst_22 = arith.constant 0.176776692 : f32
    %66 = vector.broadcast %cst_22 : f32 to vector<8x8xf32>
    %67 = arith.mulf %65, %66 : vector<8x8xf32>
    %68 = arith.addf %67, %14 : vector<8x8xf32>
    %cst_23 = arith.constant dense<0xFF800000> : vector<8xf32>
    %69 = vector.multi_reduction <maximumf>, %68, %cst_23 [1] : vector<8x8xf32> to vector<8xf32>
    %70 = vector.shape_cast %69 : vector<8xf32> to vector<8x1xf32>
    %71 = vector.broadcast %70 : vector<8x1xf32> to vector<8x8xf32>
    %72 = arith.subf %68, %71 : vector<8x8xf32>
    %73 = math.exp %72 : vector<8x8xf32>
    %cst_24 = arith.constant dense<0.000000e+00> : vector<8xf32>
    %74 = vector.multi_reduction <add>, %73, %cst_24 [1] : vector<8x8xf32> to vector<8xf32>
    %75 = vector.shape_cast %74 : vector<8xf32> to vector<8x1xf32>
    %76 = tpu.reciprocal %75 {approx = true} : vector<8x1xf32> -> vector<8x1xf32>
    %77 = vector.broadcast %76 : vector<8x1xf32> to vector<8x8xf32>
    %78 = arith.mulf %73, %77 : vector<8x8xf32>
    %79 = arith.truncf %78 : vector<8x8xf32> to vector<8x8xbf16>
    %cst_25 = arith.constant dense<0.000000e+00> : vector<8x8xf32>
    %80 = tpu.matmul %79, %64, %cst_25 {dimension_numbers = #tpu.dot_dimension_numbers<[1], [0], [0], [1], [0, 0, 1, 1], [], []>} : vector<8x8xbf16>, vector<8x8xbf16>, vector<8x8xf32> -> vector<8x8xf32>
    %81 = vector.extract_strided_slice %10 {offsets = [0, 24], sizes = [8, 8], strides = [1, 1]} : vector<8x32xf32> to vector<8x8xf32>
    %82 = arith.truncf %81 : vector<8x8xf32> to vector<8x8xbf16>
    %83 = vector.extract_strided_slice %11 {offsets = [0, 24], sizes = [8, 8], strides = [1, 1]} : vector<8x32xf32> to vector<8x8xf32>
    %84 = arith.truncf %83 : vector<8x8xf32> to vector<8x8xbf16>
    %85 = vector.extract_strided_slice %12 {offsets = [0, 24], sizes = [8, 8], strides = [1, 1]} : vector<8x32xf32> to vector<8x8xf32>
    %86 = arith.truncf %85 : vector<8x8xf32> to vector<8x8xbf16>
    %cst_26 = arith.constant dense<0.000000e+00> : vector<8x8xf32>
    %87 = tpu.matmul %82, %84, %cst_26 {dimension_numbers = #tpu.dot_dimension_numbers<[1], [1], [0], [0], [0, 0, 1, 0], [], []>} : vector<8x8xbf16>, vector<8x8xbf16>, vector<8x8xf32> -> vector<8x8xf32>
    %cst_27 = arith.constant 0.176776692 : f32
    %88 = vector.broadcast %cst_27 : f32 to vector<8x8xf32>
    %89 = arith.mulf %87, %88 : vector<8x8xf32>
    %90 = arith.addf %89, %14 : vector<8x8xf32>
    %cst_28 = arith.constant dense<0xFF800000> : vector<8xf32>
    %91 = vector.multi_reduction <maximumf>, %90, %cst_28 [1] : vector<8x8xf32> to vector<8xf32>
    %92 = vector.shape_cast %91 : vector<8xf32> to vector<8x1xf32>
    %93 = vector.broadcast %92 : vector<8x1xf32> to vector<8x8xf32>
    %94 = arith.subf %90, %93 : vector<8x8xf32>
    %95 = math.exp %94 : vector<8x8xf32>
    %cst_29 = arith.constant dense<0.000000e+00> : vector<8xf32>
    %96 = vector.multi_reduction <add>, %95, %cst_29 [1] : vector<8x8xf32> to vector<8xf32>
    %97 = vector.shape_cast %96 : vector<8xf32> to vector<8x1xf32>
    %98 = tpu.reciprocal %97 {approx = true} : vector<8x1xf32> -> vector<8x1xf32>
    %99 = vector.broadcast %98 : vector<8x1xf32> to vector<8x8xf32>
    %100 = arith.mulf %95, %99 : vector<8x8xf32>
    %101 = arith.truncf %100 : vector<8x8xf32> to vector<8x8xbf16>
    %cst_30 = arith.constant dense<0.000000e+00> : vector<8x8xf32>
    %102 = tpu.matmul %101, %86, %cst_30 {dimension_numbers = #tpu.dot_dimension_numbers<[1], [0], [0], [1], [0, 0, 1, 1], [], []>} : vector<8x8xbf16>, vector<8x8xbf16>, vector<8x8xf32> -> vector<8x8xf32>
    %103 = tpu.concatenate %36, %58, %80, %102 in 1 : vector<8x8xf32>, vector<8x8xf32>, vector<8x8xf32>, vector<8x8xf32> -> vector<8x32xf32>
    %104 = arith.truncf %103 : vector<8x32xf32> to vector<8x32xbf16>
    %c0_31 = arith.constant 0 : index
    %c0_32 = arith.constant 0 : index
    %c0_33 = arith.constant 0 : index
    %105 = vector.load %arg7[%c0_31, %c0_32, %c0_33] : memref<1x128x32xbf16, #tpu.memory_space<vmem>>, vector<1x32x32xbf16>
    %106 = vector.shape_cast %105 : vector<1x32x32xbf16> to vector<32x32xbf16>
    %cst_34 = arith.constant dense<0.000000e+00> : vector<8x32xf32>
    %107 = tpu.matmul %104, %106, %cst_34 {dimension_numbers = #tpu.dot_dimension_numbers<[1], [0], [0], [1], [0, 0, 1, 1], [], []>} : vector<8x32xbf16>, vector<32x32xbf16>, vector<8x32xf32> -> vector<8x32xf32>
    %c0_35 = arith.constant 0 : index
    %c0_36 = arith.constant 0 : index
    %c0_37 = arith.constant 0 : index
    %108 = vector.load %arg8[%c0_35, %c0_36, %c0_37] : memref<1x9x32xf32, #tpu.memory_space<vmem>>, vector<1x1x32xf32>
    %109 = vector.shape_cast %108 : vector<1x1x32xf32> to vector<1x32xf32>
    %110 = vector.broadcast %109 : vector<1x32xf32> to vector<8x32xf32>
    %111 = arith.addf %107, %110 : vector<8x32xf32>
    %112 = arith.addf %111, %3 : vector<8x32xf32>
    %c0_38 = arith.constant 0 : index
    %c1 = arith.constant 1 : index
    %c0_39 = arith.constant 0 : index
    %113 = vector.load %arg8[%c0_38, %c1, %c0_39] : memref<1x9x32xf32, #tpu.memory_space<vmem>>, vector<1x1x32xf32>
    %114 = vector.shape_cast %113 : vector<1x1x32xf32> to vector<1x32xf32>
    %c0_40 = arith.constant 0 : index
    %c2 = arith.constant 2 : index
    %c0_41 = arith.constant 0 : index
    %115 = vector.load %arg8[%c0_40, %c2, %c0_41] : memref<1x9x32xf32, #tpu.memory_space<vmem>>, vector<1x1x32xf32>
    %116 = vector.shape_cast %115 : vector<1x1x32xf32> to vector<1x32xf32>
    %cst_42 = arith.constant dense<0.000000e+00> : vector<8xf32>
    %117 = vector.multi_reduction <add>, %112, %cst_42 [1] : vector<8x32xf32> to vector<8xf32>
    %118 = vector.shape_cast %117 : vector<8xf32> to vector<8x1xf32>
    %cst_43 = arith.constant 3.200000e+01 : f32
    %119 = vector.broadcast %cst_43 : f32 to vector<8x1xf32>
    %120 = arith.divf %118, %119 : vector<8x1xf32>
    %121 = vector.broadcast %120 : vector<8x1xf32> to vector<8x32xf32>
    %122 = arith.subf %112, %121 : vector<8x32xf32>
    %123 = arith.mulf %122, %122 : vector<8x32xf32>
    %cst_44 = arith.constant dense<0.000000e+00> : vector<8xf32>
    %124 = vector.multi_reduction <add>, %123, %cst_44 [1] : vector<8x32xf32> to vector<8xf32>
    %125 = vector.shape_cast %124 : vector<8xf32> to vector<8x1xf32>
    %cst_45 = arith.constant 3.200000e+01 : f32
    %126 = vector.broadcast %cst_45 : f32 to vector<8x1xf32>
    %127 = arith.divf %125, %126 : vector<8x1xf32>
    %128 = vector.broadcast %120 : vector<8x1xf32> to vector<8x32xf32>
    %129 = arith.subf %112, %128 : vector<8x32xf32>
    %cst_46 = arith.constant 9.99999974E-6 : f32
    %130 = vector.broadcast %cst_46 : f32 to vector<8x1xf32>
    %131 = arith.addf %127, %130 : vector<8x1xf32>
    %132 = math.rsqrt %131 : vector<8x1xf32>
    %133 = vector.broadcast %132 : vector<8x1xf32> to vector<8x32xf32>
    %134 = arith.mulf %129, %133 : vector<8x32xf32>
    %135 = vector.broadcast %114 : vector<1x32xf32> to vector<8x32xf32>
    %136 = arith.mulf %134, %135 : vector<8x32xf32>
    %137 = vector.broadcast %116 : vector<1x32xf32> to vector<8x32xf32>
    %138 = arith.addf %136, %137 : vector<8x32xf32>
    %139 = arith.truncf %138 : vector<8x32xf32> to vector<8x32xbf16>
    %c0_47 = arith.constant 0 : index
    %c0_48 = arith.constant 0 : index
    %c96 = arith.constant 96 : index
    %140 = vector.load %arg6[%c0_47, %c0_48, %c96] : memref<1x32x256xbf16, #tpu.memory_space<vmem>>, vector<1x32x32xbf16>
    %141 = vector.shape_cast %140 : vector<1x32x32xbf16> to vector<32x32xbf16>
    %cst_49 = arith.constant dense<0.000000e+00> : vector<8x32xf32>
    %142 = tpu.matmul %139, %141, %cst_49 {dimension_numbers = #tpu.dot_dimension_numbers<[1], [0], [0], [1], [0, 0, 1, 1], [], []>} : vector<8x32xbf16>, vector<32x32xbf16>, vector<8x32xf32> -> vector<8x32xf32>
    %c0_50 = arith.constant 0 : index
    %c0_51 = arith.constant 0 : index
    %c128 = arith.constant 128 : index
    %143 = vector.load %arg6[%c0_50, %c0_51, %c128] : memref<1x32x256xbf16, #tpu.memory_space<vmem>>, vector<1x32x64xbf16>
    %144 = vector.shape_cast %143 : vector<1x32x64xbf16> to vector<32x64xbf16>
    %cst_52 = arith.constant dense<0.000000e+00> : vector<8x64xf32>
    %145 = tpu.matmul %5, %144, %cst_52 {dimension_numbers = #tpu.dot_dimension_numbers<[1], [0], [0], [1], [0, 0, 1, 1], [], []>} : vector<8x32xbf16>, vector<32x64xbf16>, vector<8x64xf32> -> vector<8x64xf32>
    %146 = vector.extract_strided_slice %145 {offsets = [0, 0], sizes = [8, 32], strides = [1, 1]} : vector<8x64xf32> to vector<8x32xf32>
    %147 = vector.extract_strided_slice %145 {offsets = [0, 32], sizes = [8, 32], strides = [1, 1]} : vector<8x64xf32> to vector<8x32xf32>
    %c0_53 = arith.constant 0 : index
    %c0_54 = arith.constant 0 : index
    %c0_55 = arith.constant 0 : index
    %148 = vector.load %arg5[%c0_53, %c0_54, %c0_55] : memref<1x1x8xf32, #tpu.memory_space<vmem>>, vector<1x1x8xf32>
    %149 = vector.shape_cast %148 : vector<1x1x8xf32> to vector<1x8xf32>
    %150 = vector.extract_strided_slice %142 {offsets = [0, 0], sizes = [8, 8], strides = [1, 1]} : vector<8x32xf32> to vector<8x8xf32>
    %151 = arith.truncf %150 : vector<8x8xf32> to vector<8x8xbf16>
    %152 = vector.extract_strided_slice %146 {offsets = [0, 0], sizes = [8, 8], strides = [1, 1]} : vector<8x32xf32> to vector<8x8xf32>
    %153 = arith.truncf %152 : vector<8x8xf32> to vector<8x8xbf16>
    %154 = vector.extract_strided_slice %147 {offsets = [0, 0], sizes = [8, 8], strides = [1, 1]} : vector<8x32xf32> to vector<8x8xf32>
    %155 = arith.truncf %154 : vector<8x8xf32> to vector<8x8xbf16>
    %cst_56 = arith.constant dense<0.000000e+00> : vector<8x8xf32>
    %156 = tpu.matmul %151, %153, %cst_56 {dimension_numbers = #tpu.dot_dimension_numbers<[1], [1], [0], [0], [0, 0, 1, 0], [], []>} : vector<8x8xbf16>, vector<8x8xbf16>, vector<8x8xf32> -> vector<8x8xf32>
    %cst_57 = arith.constant 0.176776692 : f32
    %157 = vector.broadcast %cst_57 : f32 to vector<8x8xf32>
    %158 = arith.mulf %156, %157 : vector<8x8xf32>
    %159 = vector.broadcast %149 : vector<1x8xf32> to vector<8x8xf32>
    %160 = arith.addf %158, %159 : vector<8x8xf32>
    %cst_58 = arith.constant dense<0xFF800000> : vector<8xf32>
    %161 = vector.multi_reduction <maximumf>, %160, %cst_58 [1] : vector<8x8xf32> to vector<8xf32>
    %162 = vector.shape_cast %161 : vector<8xf32> to vector<8x1xf32>
    %163 = vector.broadcast %162 : vector<8x1xf32> to vector<8x8xf32>
    %164 = arith.subf %160, %163 : vector<8x8xf32>
    %165 = math.exp %164 : vector<8x8xf32>
    %cst_59 = arith.constant dense<0.000000e+00> : vector<8xf32>
    %166 = vector.multi_reduction <add>, %165, %cst_59 [1] : vector<8x8xf32> to vector<8xf32>
    %167 = vector.shape_cast %166 : vector<8xf32> to vector<8x1xf32>
    %168 = tpu.reciprocal %167 {approx = true} : vector<8x1xf32> -> vector<8x1xf32>
    %169 = vector.broadcast %168 : vector<8x1xf32> to vector<8x8xf32>
    %170 = arith.mulf %165, %169 : vector<8x8xf32>
    %171 = arith.truncf %170 : vector<8x8xf32> to vector<8x8xbf16>
    %cst_60 = arith.constant dense<0.000000e+00> : vector<8x8xf32>
    %172 = tpu.matmul %171, %155, %cst_60 {dimension_numbers = #tpu.dot_dimension_numbers<[1], [0], [0], [1], [0, 0, 1, 1], [], []>} : vector<8x8xbf16>, vector<8x8xbf16>, vector<8x8xf32> -> vector<8x8xf32>
    %173 = vector.extract_strided_slice %142 {offsets = [0, 8], sizes = [8, 8], strides = [1, 1]} : vector<8x32xf32> to vector<8x8xf32>
    %174 = arith.truncf %173 : vector<8x8xf32> to vector<8x8xbf16>
    %175 = vector.extract_strided_slice %146 {offsets = [0, 8], sizes = [8, 8], strides = [1, 1]} : vector<8x32xf32> to vector<8x8xf32>
    %176 = arith.truncf %175 : vector<8x8xf32> to vector<8x8xbf16>
    %177 = vector.extract_strided_slice %147 {offsets = [0, 8], sizes = [8, 8], strides = [1, 1]} : vector<8x32xf32> to vector<8x8xf32>
    %178 = arith.truncf %177 : vector<8x8xf32> to vector<8x8xbf16>
    %cst_61 = arith.constant dense<0.000000e+00> : vector<8x8xf32>
    %179 = tpu.matmul %174, %176, %cst_61 {dimension_numbers = #tpu.dot_dimension_numbers<[1], [1], [0], [0], [0, 0, 1, 0], [], []>} : vector<8x8xbf16>, vector<8x8xbf16>, vector<8x8xf32> -> vector<8x8xf32>
    %cst_62 = arith.constant 0.176776692 : f32
    %180 = vector.broadcast %cst_62 : f32 to vector<8x8xf32>
    %181 = arith.mulf %179, %180 : vector<8x8xf32>
    %182 = vector.broadcast %149 : vector<1x8xf32> to vector<8x8xf32>
    %183 = arith.addf %181, %182 : vector<8x8xf32>
    %cst_63 = arith.constant dense<0xFF800000> : vector<8xf32>
    %184 = vector.multi_reduction <maximumf>, %183, %cst_63 [1] : vector<8x8xf32> to vector<8xf32>
    %185 = vector.shape_cast %184 : vector<8xf32> to vector<8x1xf32>
    %186 = vector.broadcast %185 : vector<8x1xf32> to vector<8x8xf32>
    %187 = arith.subf %183, %186 : vector<8x8xf32>
    %188 = math.exp %187 : vector<8x8xf32>
    %cst_64 = arith.constant dense<0.000000e+00> : vector<8xf32>
    %189 = vector.multi_reduction <add>, %188, %cst_64 [1] : vector<8x8xf32> to vector<8xf32>
    %190 = vector.shape_cast %189 : vector<8xf32> to vector<8x1xf32>
    %191 = tpu.reciprocal %190 {approx = true} : vector<8x1xf32> -> vector<8x1xf32>
    %192 = vector.broadcast %191 : vector<8x1xf32> to vector<8x8xf32>
    %193 = arith.mulf %188, %192 : vector<8x8xf32>
    %194 = arith.truncf %193 : vector<8x8xf32> to vector<8x8xbf16>
    %cst_65 = arith.constant dense<0.000000e+00> : vector<8x8xf32>
    %195 = tpu.matmul %194, %178, %cst_65 {dimension_numbers = #tpu.dot_dimension_numbers<[1], [0], [0], [1], [0, 0, 1, 1], [], []>} : vector<8x8xbf16>, vector<8x8xbf16>, vector<8x8xf32> -> vector<8x8xf32>
    %196 = vector.extract_strided_slice %142 {offsets = [0, 16], sizes = [8, 8], strides = [1, 1]} : vector<8x32xf32> to vector<8x8xf32>
    %197 = arith.truncf %196 : vector<8x8xf32> to vector<8x8xbf16>
    %198 = vector.extract_strided_slice %146 {offsets = [0, 16], sizes = [8, 8], strides = [1, 1]} : vector<8x32xf32> to vector<8x8xf32>
    %199 = arith.truncf %198 : vector<8x8xf32> to vector<8x8xbf16>
    %200 = vector.extract_strided_slice %147 {offsets = [0, 16], sizes = [8, 8], strides = [1, 1]} : vector<8x32xf32> to vector<8x8xf32>
    %201 = arith.truncf %200 : vector<8x8xf32> to vector<8x8xbf16>
    %cst_66 = arith.constant dense<0.000000e+00> : vector<8x8xf32>
    %202 = tpu.matmul %197, %199, %cst_66 {dimension_numbers = #tpu.dot_dimension_numbers<[1], [1], [0], [0], [0, 0, 1, 0], [], []>} : vector<8x8xbf16>, vector<8x8xbf16>, vector<8x8xf32> -> vector<8x8xf32>
    %cst_67 = arith.constant 0.176776692 : f32
    %203 = vector.broadcast %cst_67 : f32 to vector<8x8xf32>
    %204 = arith.mulf %202, %203 : vector<8x8xf32>
    %205 = vector.broadcast %149 : vector<1x8xf32> to vector<8x8xf32>
    %206 = arith.addf %204, %205 : vector<8x8xf32>
    %cst_68 = arith.constant dense<0xFF800000> : vector<8xf32>
    %207 = vector.multi_reduction <maximumf>, %206, %cst_68 [1] : vector<8x8xf32> to vector<8xf32>
    %208 = vector.shape_cast %207 : vector<8xf32> to vector<8x1xf32>
    %209 = vector.broadcast %208 : vector<8x1xf32> to vector<8x8xf32>
    %210 = arith.subf %206, %209 : vector<8x8xf32>
    %211 = math.exp %210 : vector<8x8xf32>
    %cst_69 = arith.constant dense<0.000000e+00> : vector<8xf32>
    %212 = vector.multi_reduction <add>, %211, %cst_69 [1] : vector<8x8xf32> to vector<8xf32>
    %213 = vector.shape_cast %212 : vector<8xf32> to vector<8x1xf32>
    %214 = tpu.reciprocal %213 {approx = true} : vector<8x1xf32> -> vector<8x1xf32>
    %215 = vector.broadcast %214 : vector<8x1xf32> to vector<8x8xf32>
    %216 = arith.mulf %211, %215 : vector<8x8xf32>
    %217 = arith.truncf %216 : vector<8x8xf32> to vector<8x8xbf16>
    %cst_70 = arith.constant dense<0.000000e+00> : vector<8x8xf32>
    %218 = tpu.matmul %217, %201, %cst_70 {dimension_numbers = #tpu.dot_dimension_numbers<[1], [0], [0], [1], [0, 0, 1, 1], [], []>} : vector<8x8xbf16>, vector<8x8xbf16>, vector<8x8xf32> -> vector<8x8xf32>
    %219 = vector.extract_strided_slice %142 {offsets = [0, 24], sizes = [8, 8], strides = [1, 1]} : vector<8x32xf32> to vector<8x8xf32>
    %220 = arith.truncf %219 : vector<8x8xf32> to vector<8x8xbf16>
    %221 = vector.extract_strided_slice %146 {offsets = [0, 24], sizes = [8, 8], strides = [1, 1]} : vector<8x32xf32> to vector<8x8xf32>
    %222 = arith.truncf %221 : vector<8x8xf32> to vector<8x8xbf16>
    %223 = vector.extract_strided_slice %147 {offsets = [0, 24], sizes = [8, 8], strides = [1, 1]} : vector<8x32xf32> to vector<8x8xf32>
    %224 = arith.truncf %223 : vector<8x8xf32> to vector<8x8xbf16>
    %cst_71 = arith.constant dense<0.000000e+00> : vector<8x8xf32>
    %225 = tpu.matmul %220, %222, %cst_71 {dimension_numbers = #tpu.dot_dimension_numbers<[1], [1], [0], [0], [0, 0, 1, 0], [], []>} : vector<8x8xbf16>, vector<8x8xbf16>, vector<8x8xf32> -> vector<8x8xf32>
    %cst_72 = arith.constant 0.176776692 : f32
    %226 = vector.broadcast %cst_72 : f32 to vector<8x8xf32>
    %227 = arith.mulf %225, %226 : vector<8x8xf32>
    %228 = vector.broadcast %149 : vector<1x8xf32> to vector<8x8xf32>
    %229 = arith.addf %227, %228 : vector<8x8xf32>
    %cst_73 = arith.constant dense<0xFF800000> : vector<8xf32>
    %230 = vector.multi_reduction <maximumf>, %229, %cst_73 [1] : vector<8x8xf32> to vector<8xf32>
    %231 = vector.shape_cast %230 : vector<8xf32> to vector<8x1xf32>
    %232 = vector.broadcast %231 : vector<8x1xf32> to vector<8x8xf32>
    %233 = arith.subf %229, %232 : vector<8x8xf32>
    %234 = math.exp %233 : vector<8x8xf32>
    %cst_74 = arith.constant dense<0.000000e+00> : vector<8xf32>
    %235 = vector.multi_reduction <add>, %234, %cst_74 [1] : vector<8x8xf32> to vector<8xf32>
    %236 = vector.shape_cast %235 : vector<8xf32> to vector<8x1xf32>
    %237 = tpu.reciprocal %236 {approx = true} : vector<8x1xf32> -> vector<8x1xf32>
    %238 = vector.broadcast %237 : vector<8x1xf32> to vector<8x8xf32>
    %239 = arith.mulf %234, %238 : vector<8x8xf32>
    %240 = arith.truncf %239 : vector<8x8xf32> to vector<8x8xbf16>
    %cst_75 = arith.constant dense<0.000000e+00> : vector<8x8xf32>
    %241 = tpu.matmul %240, %224, %cst_75 {dimension_numbers = #tpu.dot_dimension_numbers<[1], [0], [0], [1], [0, 0, 1, 1], [], []>} : vector<8x8xbf16>, vector<8x8xbf16>, vector<8x8xf32> -> vector<8x8xf32>
    %242 = tpu.concatenate %172, %195, %218, %241 in 1 : vector<8x8xf32>, vector<8x8xf32>, vector<8x8xf32>, vector<8x8xf32> -> vector<8x32xf32>
    %243 = arith.truncf %242 : vector<8x32xf32> to vector<8x32xbf16>
    %c0_76 = arith.constant 0 : index
    %c32 = arith.constant 32 : index
    %c0_77 = arith.constant 0 : index
    %244 = vector.load %arg7[%c0_76, %c32, %c0_77] : memref<1x128x32xbf16, #tpu.memory_space<vmem>>, vector<1x32x32xbf16>
    %245 = vector.shape_cast %244 : vector<1x32x32xbf16> to vector<32x32xbf16>
    %cst_78 = arith.constant dense<0.000000e+00> : vector<8x32xf32>
    %246 = tpu.matmul %243, %245, %cst_78 {dimension_numbers = #tpu.dot_dimension_numbers<[1], [0], [0], [1], [0, 0, 1, 1], [], []>} : vector<8x32xbf16>, vector<32x32xbf16>, vector<8x32xf32> -> vector<8x32xf32>
    %c0_79 = arith.constant 0 : index
    %c3 = arith.constant 3 : index
    %c0_80 = arith.constant 0 : index
    %247 = vector.load %arg8[%c0_79, %c3, %c0_80] : memref<1x9x32xf32, #tpu.memory_space<vmem>>, vector<1x1x32xf32>
    %248 = vector.shape_cast %247 : vector<1x1x32xf32> to vector<1x32xf32>
    %249 = vector.broadcast %248 : vector<1x32xf32> to vector<8x32xf32>
    %250 = arith.addf %246, %249 : vector<8x32xf32>
    %251 = arith.addf %250, %138 : vector<8x32xf32>
    %c0_81 = arith.constant 0 : index
    %c4 = arith.constant 4 : index
    %c0_82 = arith.constant 0 : index
    %252 = vector.load %arg8[%c0_81, %c4, %c0_82] : memref<1x9x32xf32, #tpu.memory_space<vmem>>, vector<1x1x32xf32>
    %253 = vector.shape_cast %252 : vector<1x1x32xf32> to vector<1x32xf32>
    %c0_83 = arith.constant 0 : index
    %c5 = arith.constant 5 : index
    %c0_84 = arith.constant 0 : index
    %254 = vector.load %arg8[%c0_83, %c5, %c0_84] : memref<1x9x32xf32, #tpu.memory_space<vmem>>, vector<1x1x32xf32>
    %255 = vector.shape_cast %254 : vector<1x1x32xf32> to vector<1x32xf32>
    %cst_85 = arith.constant dense<0.000000e+00> : vector<8xf32>
    %256 = vector.multi_reduction <add>, %251, %cst_85 [1] : vector<8x32xf32> to vector<8xf32>
    %257 = vector.shape_cast %256 : vector<8xf32> to vector<8x1xf32>
    %cst_86 = arith.constant 3.200000e+01 : f32
    %258 = vector.broadcast %cst_86 : f32 to vector<8x1xf32>
    %259 = arith.divf %257, %258 : vector<8x1xf32>
    %260 = vector.broadcast %259 : vector<8x1xf32> to vector<8x32xf32>
    %261 = arith.subf %251, %260 : vector<8x32xf32>
    %262 = arith.mulf %261, %261 : vector<8x32xf32>
    %cst_87 = arith.constant dense<0.000000e+00> : vector<8xf32>
    %263 = vector.multi_reduction <add>, %262, %cst_87 [1] : vector<8x32xf32> to vector<8xf32>
    %264 = vector.shape_cast %263 : vector<8xf32> to vector<8x1xf32>
    %cst_88 = arith.constant 3.200000e+01 : f32
    %265 = vector.broadcast %cst_88 : f32 to vector<8x1xf32>
    %266 = arith.divf %264, %265 : vector<8x1xf32>
    %267 = vector.broadcast %259 : vector<8x1xf32> to vector<8x32xf32>
    %268 = arith.subf %251, %267 : vector<8x32xf32>
    %cst_89 = arith.constant 9.99999974E-6 : f32
    %269 = vector.broadcast %cst_89 : f32 to vector<8x1xf32>
    %270 = arith.addf %266, %269 : vector<8x1xf32>
    %271 = math.rsqrt %270 : vector<8x1xf32>
    %272 = vector.broadcast %271 : vector<8x1xf32> to vector<8x32xf32>
    %273 = arith.mulf %268, %272 : vector<8x32xf32>
    %274 = vector.broadcast %253 : vector<1x32xf32> to vector<8x32xf32>
    %275 = arith.mulf %273, %274 : vector<8x32xf32>
    %276 = vector.broadcast %255 : vector<1x32xf32> to vector<8x32xf32>
    %277 = arith.addf %275, %276 : vector<8x32xf32>
    %278 = arith.truncf %277 : vector<8x32xf32> to vector<8x32xbf16>
    %c0_90 = arith.constant 0 : index
    %c0_91 = arith.constant 0 : index
    %c192 = arith.constant 192 : index
    %279 = vector.load %arg6[%c0_90, %c0_91, %c192] : memref<1x32x256xbf16, #tpu.memory_space<vmem>>, vector<1x32x64xbf16>
    %280 = vector.shape_cast %279 : vector<1x32x64xbf16> to vector<32x64xbf16>
    %cst_92 = arith.constant dense<0.000000e+00> : vector<8x64xf32>
    %281 = tpu.matmul %278, %280, %cst_92 {dimension_numbers = #tpu.dot_dimension_numbers<[1], [0], [0], [1], [0, 0, 1, 1], [], []>} : vector<8x32xbf16>, vector<32x64xbf16>, vector<8x64xf32> -> vector<8x64xf32>
    %c0_93 = arith.constant 0 : index
    %c0_94 = arith.constant 0 : index
    %c0_95 = arith.constant 0 : index
    %282 = vector.load %arg9[%c0_93, %c0_94, %c0_95] : memref<1x1x64xf32, #tpu.memory_space<vmem>>, vector<1x1x64xf32>
    %283 = vector.shape_cast %282 : vector<1x1x64xf32> to vector<1x64xf32>
    %284 = vector.broadcast %283 : vector<1x64xf32> to vector<8x64xf32>
    %285 = arith.addf %281, %284 : vector<8x64xf32>
    %cst_96 = arith.constant 0.000000e+00 : f32
    %286 = vector.broadcast %cst_96 : f32 to vector<8x64xf32>
    %287 = arith.maximumf %285, %286 : vector<8x64xf32>
    %288 = arith.truncf %287 : vector<8x64xf32> to vector<8x64xbf16>
    %c0_97 = arith.constant 0 : index
    %c64 = arith.constant 64 : index
    %c0_98 = arith.constant 0 : index
    %289 = vector.load %arg7[%c0_97, %c64, %c0_98] : memref<1x128x32xbf16, #tpu.memory_space<vmem>>, vector<1x64x32xbf16>
    %290 = vector.shape_cast %289 : vector<1x64x32xbf16> to vector<64x32xbf16>
    %cst_99 = arith.constant dense<0.000000e+00> : vector<8x32xf32>
    %291 = tpu.matmul %288, %290, %cst_99 {dimension_numbers = #tpu.dot_dimension_numbers<[1], [0], [0], [1], [0, 0, 1, 1], [], []>} : vector<8x64xbf16>, vector<64x32xbf16>, vector<8x32xf32> -> vector<8x32xf32>
    %c0_100 = arith.constant 0 : index
    %c6 = arith.constant 6 : index
    %c0_101 = arith.constant 0 : index
    %292 = vector.load %arg8[%c0_100, %c6, %c0_101] : memref<1x9x32xf32, #tpu.memory_space<vmem>>, vector<1x1x32xf32>
    %293 = vector.shape_cast %292 : vector<1x1x32xf32> to vector<1x32xf32>
    %294 = vector.broadcast %293 : vector<1x32xf32> to vector<8x32xf32>
    %295 = arith.addf %291, %294 : vector<8x32xf32>
    %296 = arith.addf %295, %277 : vector<8x32xf32>
    %c0_102 = arith.constant 0 : index
    %c7 = arith.constant 7 : index
    %c0_103 = arith.constant 0 : index
    %297 = vector.load %arg8[%c0_102, %c7, %c0_103] : memref<1x9x32xf32, #tpu.memory_space<vmem>>, vector<1x1x32xf32>
    %298 = vector.shape_cast %297 : vector<1x1x32xf32> to vector<1x32xf32>
    %c0_104 = arith.constant 0 : index
    %c8 = arith.constant 8 : index
    %c0_105 = arith.constant 0 : index
    %299 = vector.load %arg8[%c0_104, %c8, %c0_105] : memref<1x9x32xf32, #tpu.memory_space<vmem>>, vector<1x1x32xf32>
    %300 = vector.shape_cast %299 : vector<1x1x32xf32> to vector<1x32xf32>
    %cst_106 = arith.constant dense<0.000000e+00> : vector<8xf32>
    %301 = vector.multi_reduction <add>, %296, %cst_106 [1] : vector<8x32xf32> to vector<8xf32>
    %302 = vector.shape_cast %301 : vector<8xf32> to vector<8x1xf32>
    %cst_107 = arith.constant 3.200000e+01 : f32
    %303 = vector.broadcast %cst_107 : f32 to vector<8x1xf32>
    %304 = arith.divf %302, %303 : vector<8x1xf32>
    %305 = vector.broadcast %304 : vector<8x1xf32> to vector<8x32xf32>
    %306 = arith.subf %296, %305 : vector<8x32xf32>
    %307 = arith.mulf %306, %306 : vector<8x32xf32>
    %cst_108 = arith.constant dense<0.000000e+00> : vector<8xf32>
    %308 = vector.multi_reduction <add>, %307, %cst_108 [1] : vector<8x32xf32> to vector<8xf32>
    %309 = vector.shape_cast %308 : vector<8xf32> to vector<8x1xf32>
    %cst_109 = arith.constant 3.200000e+01 : f32
    %310 = vector.broadcast %cst_109 : f32 to vector<8x1xf32>
    %311 = arith.divf %309, %310 : vector<8x1xf32>
    %312 = vector.broadcast %304 : vector<8x1xf32> to vector<8x32xf32>
    %313 = arith.subf %296, %312 : vector<8x32xf32>
    %cst_110 = arith.constant 9.99999974E-6 : f32
    %314 = vector.broadcast %cst_110 : f32 to vector<8x1xf32>
    %315 = arith.addf %311, %314 : vector<8x1xf32>
    %316 = math.rsqrt %315 : vector<8x1xf32>
    %317 = vector.broadcast %316 : vector<8x1xf32> to vector<8x32xf32>
    %318 = arith.mulf %313, %317 : vector<8x32xf32>
    %319 = vector.broadcast %298 : vector<1x32xf32> to vector<8x32xf32>
    %320 = arith.mulf %318, %319 : vector<8x32xf32>
    %321 = vector.broadcast %300 : vector<1x32xf32> to vector<8x32xf32>
    %322 = arith.addf %320, %321 : vector<8x32xf32>
    %c0_111 = arith.constant 0 : index
    %c0_112 = arith.constant 0 : index
    %323 = vector.load %arg13[%c0_111, %c0_112] : memref<8x32xf32, #tpu.memory_space<vmem>>, vector<8x32xf32>
    tpu.vector_store %arg13[%c0_111, %c0_112], %322 {strides = array<i32>} : memref<8x32xf32, #tpu.memory_space<vmem>>, vector<8x32xf32>,
    %c1_i32 = arith.constant 1 : i32
    %324 = arith.cmpi eq, %arg1, %c1_i32 : i32
    %325 = arith.extui %324 : i1 to i32
    %c0_i32_113 = arith.constant 0 : i32
    %326 = arith.cmpi ne, %325, %c0_i32_113 : i32
    scf.if %326 {
      %327 = arith.truncf %322 : vector<8x32xf32> to vector<8x32xbf16>
      %c0_114 = arith.constant 0 : index
      %c0_115 = arith.constant 0 : index
      %328 = vector.load %arg10[%c0_114, %c0_115] : memref<32x128xbf16, #tpu.memory_space<vmem>>, vector<32x128xbf16>
      %cst_116 = arith.constant dense<0.000000e+00> : vector<8x128xf32>
      %329 = tpu.matmul %327, %328, %cst_116 {dimension_numbers = #tpu.dot_dimension_numbers<[1], [0], [0], [1], [0, 0, 1, 1], [], []>} : vector<8x32xbf16>, vector<32x128xbf16>, vector<8x128xf32> -> vector<8x128xf32>
      %c0_117 = arith.constant 0 : index
      %c0_118 = arith.constant 0 : index
      %330 = vector.load %arg11[%c0_117, %c0_118] : memref<1x128xf32, #tpu.memory_space<vmem>>, vector<1x128xf32>
      %331 = vector.broadcast %330 : vector<1x128xf32> to vector<8x128xf32>
      %332 = arith.addf %329, %331 : vector<8x128xf32>
      %c0_119 = arith.constant 0 : index
      %c0_120 = arith.constant 0 : index
      %c0_121 = arith.constant 0 : index
      %333 = vector.load %arg12[%c0_119, %c0_120, %c0_121] : memref<1x8x128xf32, #tpu.memory_space<vmem>>, vector<1x8x128xf32>
      %334 = vector.shape_cast %333 : vector<1x8x128xf32> to vector<8x128xf32>
      %335 = vector.shape_cast %332 : vector<8x128xf32> to vector<1x8x128xf32>
      tpu.vector_store %arg12[%c0_119, %c0_120, %c0_121], %335 {strides = array<i32>} : memref<1x8x128xf32, #tpu.memory_space<vmem>>, vector<1x8x128xf32>,
    } else {
    }
    return
  }
  func.func @transform_0(%arg0: i32, %arg1: i32) -> (i32, i32, i32) {
    %c0_i32 = arith.constant 0 : i32
    %c0_i32_0 = arith.constant 0 : i32
    %c0_i32_1 = arith.constant 0 : i32
    return %arg0, %c0_i32, %c0_i32_0 : i32, i32, i32
  }
  func.func @transform_1(%arg0: i32, %arg1: i32) -> (i32, i32, i32) {
    %c0_i32 = arith.constant 0 : i32
    %c0_i32_0 = arith.constant 0 : i32
    %c0_i32_1 = arith.constant 0 : i32
    return %arg0, %c0_i32, %c0_i32_0 : i32, i32, i32
  }
  func.func @transform_2(%arg0: i32, %arg1: i32) -> (i32, i32, i32) {
    %c0_i32 = arith.constant 0 : i32
    %c0_i32_0 = arith.constant 0 : i32
    %c0_i32_1 = arith.constant 0 : i32
    %c0_i32_2 = arith.constant 0 : i32
    return %c0_i32, %c0_i32_0, %c0_i32_1 : i32, i32, i32
  }
  func.func @transform_3(%arg0: i32, %arg1: i32) -> (i32, i32, i32) {
    %c0_i32 = arith.constant 0 : i32
    %c0_i32_0 = arith.constant 0 : i32
    %c0_i32_1 = arith.constant 0 : i32
    return %arg0, %c0_i32, %c0_i32_0 : i32, i32, i32
  }
  func.func @transform_4(%arg0: i32, %arg1: i32) -> (i32, i32, i32) {
    %c0_i32 = arith.constant 0 : i32
    %c0_i32_0 = arith.constant 0 : i32
    %c0_i32_1 = arith.constant 0 : i32
    return %arg1, %c0_i32, %c0_i32_0 : i32, i32, i32
  }
  func.func @transform_5(%arg0: i32, %arg1: i32) -> (i32, i32, i32) {
    %c0_i32 = arith.constant 0 : i32
    %c0_i32_0 = arith.constant 0 : i32
    %c0_i32_1 = arith.constant 0 : i32
    return %arg1, %c0_i32, %c0_i32_0 : i32, i32, i32
  }
  func.func @transform_6(%arg0: i32, %arg1: i32) -> (i32, i32, i32) {
    %c0_i32 = arith.constant 0 : i32
    %c0_i32_0 = arith.constant 0 : i32
    %c0_i32_1 = arith.constant 0 : i32
    return %arg1, %c0_i32, %c0_i32_0 : i32, i32, i32
  }
  func.func @transform_7(%arg0: i32, %arg1: i32) -> (i32, i32, i32) {
    %c0_i32 = arith.constant 0 : i32
    %c0_i32_0 = arith.constant 0 : i32
    %c0_i32_1 = arith.constant 0 : i32
    return %arg1, %c0_i32, %c0_i32_0 : i32, i32, i32
  }
  func.func @transform_8(%arg0: i32, %arg1: i32) -> (i32, i32) {
    %c0_i32 = arith.constant 0 : i32
    %c0_i32_0 = arith.constant 0 : i32
    %c0_i32_1 = arith.constant 0 : i32
    return %c0_i32, %c0_i32_0 : i32, i32
  }
  func.func @transform_9(%arg0: i32, %arg1: i32) -> (i32, i32) {
    %c0_i32 = arith.constant 0 : i32
    %c0_i32_0 = arith.constant 0 : i32
    %c0_i32_1 = arith.constant 0 : i32
    return %c0_i32, %c0_i32_0 : i32, i32
  }
  func.func @transform_10(%arg0: i32, %arg1: i32) -> (i32, i32, i32) {
    %c0_i32 = arith.constant 0 : i32
    %c0_i32_0 = arith.constant 0 : i32
    %c0_i32_1 = arith.constant 0 : i32
    return %arg0, %c0_i32, %c0_i32_0 : i32, i32, i32
  }
}

</mosaic_0001>

<bundles_post_ra>
// kernel: decoder_forward.1
= control target key start
LH: loop header
LB: loop body
LE: loop exit
PB: predicated region body
PF: predicated region fallthrough
CT: control target
= control target key end

     0   :  { %s3214_s0 = inlined_call_operand.vmem [shape: bf16[2,8,32], index: 0, kind: input, shape index: {}]   ;;  %s3215_s1 = inlined_call_operand.vmem [shape: bf16[2,8,32], index: 1, kind: input, shape index: {}]   ;;  %s3216_s2 = inlined_call_operand.vmem [shape: f32[1,8,8], index: 2, kind: input, shape index: {}]   ;;  %s3217_s3 = inlined_call_operand.vmem [shape: f32[2,1,8], index: 3, kind: input, shape index: {}]   ;;  %s3218_s4 = inlined_call_operand.vmem [shape: bf16[2,32,256], index: 4, kind: input, shape index: {}]   ;;  %s3219_s5 = inlined_call_operand.vmem [shape: bf16[2,128,32], index: 5, kind: input, shape index: {}]   ;;  %s3220_s6 = inlined_call_operand.vmem [shape: f32[2,9,32], index: 6, kind: input, shape index: {}]   ;;  %s3221_s7 = inlined_call_operand.vmem [shape: f32[2,1,64], index: 7, kind: input, shape index: {}]   ;;  %s3222_s8 = inlined_call_operand.vmem [shape: bf16[32,128], index: 8, kind: input, shape index: {}]   ;;  %s3223_s9 = inlined_call_operand.vmem [shape: f32[1,128], index: 9, kind: input, shape index: {}]   ;;  %s3224_s10 = inlined_call_operand.hbm [shape: f32[2,8,128], index: 10, kind: output, shape index: {}]  }
   0x1   :  { %3239 = sst [smem:[#allocation18_spill]] %s3214_s0 }
   0x2   :  { %3240 = sst [smem:[#allocation19_spill]] %s3224_s10 }
   0x3   :  { %15 = vsyncpa [#allocation4], 0 }
   0x4   :  { %17 = vsyncpa [#allocation4 + $0x1], 0  ;;  %s2771_s13 = smov 0   ;;  %s2773_s14 = smov 0  }
   0x5   :  { %s2775_s15 = smov 0   ;;  %s2777_s16 = smov 0  }
   0x6   :  { %s2779_s17 = smov 0   ;;  %s2781_s18 = smov 0  }
   0x7   :  { %s2783_s19 = smov 0   ;;  %s2785_s20 = smov 0  }
   0x8 LB: > { %3241 = sst [smem:[#allocation6_spill]] %s2666_s13  ;;  %s2163_s21 = sadd.s32 4294967295, %s2694_s20   ;;  %s2694_s20 = sphi %s2785_s20, %s23_s20   ;;  %s2690_s19 = sphi %s2783_s19, %s3271_s19   ;;  %s2686_s18 = sphi %s2781_s18, %s3270_s18   ;;  %s2682_s17 = sphi %s2779_s17, %s3269_s17   ;;  %s2678_s16 = sphi %s2777_s16, %s3268_s16   ;;  %s2674_s15 = sphi %s2775_s15, %s3267_s15   ;;  %s2670_s14 = sphi %s2773_s14, %s3266_s14   ;;  %s2666_s13 = sphi %s2771_s13, %s3265_s13  }
   0x9   : > { %3242 = sst [smem:[#allocation7_spill]] %s2670_s14  ;;  %s2164_s22 = sadd.s32 4294967294, %s2694_s20  }
   0xa   : > { %3243 = sst [smem:[#allocation8_spill]] %s2674_s15  ;;  %s32_s23 = sadd.s32 1, %s2686_s18 }
   0xb   : > { %3244 = sst [smem:[#allocation9_spill]] %s2682_s17  ;;  %p33_p0 = scmp.ge.s32.totalorder %s32_s23, 2 }
   0xc   : > { %3245 = sst [smem:[#allocation10_spill]] %s2686_s18  ;;  %s35_s24 = sadd.s32 1, %s2690_s19 }
   0xd   : > { %3246 = sst [smem:[#allocation11_spill]] %s2690_s19  ;;  %p297_p1 = scmp.ne.s32.totalorder %s2674_s15, %s2670_s14 }
   0xe   : > { %3247 = sst [smem:[#allocation12_spill]] %s2694_s20  ;;  %p298_p2 = scmp.eq.s32.totalorder %s2163_s21, 3 }
   0xf   : > { %s3273_s23 = smov (%p33_p0, %s32_s23), 0  ;;  %s3275_s24 = smov (!%p33_p0, %s35_s24), %s2690_s19 }
  0x10   : > { %3248 = sst [smem:[#allocation13_spill]] %s3273_s23  ;;  %p2820_p3 = por %p298_p2, %p297_p1 }
  0x11   : > { %p303_p4 = scmp.ne.s32.totalorder %s2670_s14, %s2666_s13  ;;  %p37_p5 = scmp.ge.s32.totalorder %s3275_s24, 2 }
  0x12   : > { %s3249_s25 = scalar_select %p2820_p3, 1, 0 }
  0x13   : > { %p304_p6 = scmp.eq.s32.totalorder %s2164_s22, 3  ;;  %p2167_p7 = scmp.ge.s32.totalorder %s2694_s20, 1 }
  0x14   : > { %3250 = sst [smem:[#allocation14_spill]] %s3249_s25  ;;  %p381_p8 = scmp.lt.s32.totalorder %s2694_s20, 5 }
  0x15   : > { %s3277_s24 = smov (%p37_p5, %s3275_s24), 0  ;;  %p2830_p9 = por %p304_p6, %p303_p4 }
  0x16   : > { %3251 = sst [smem:[#allocation15_spill]] %s3277_s24  ;;  %p382_p10 = pnand %p2167_p7, %p381_p8 }
  0x17   : > { %s3252_s26 = scalar_select %p2830_p9, 1, 0 }
  0x18   : > { %s284_s27 = ssub.s32 %s2690_s19, %s3277_s24  ;;  %s287_s28 = sadd.s32 1, %s2674_s15 }
  0x19   : > { %3253 = sst [smem:[#allocation16_spill]] %s3252_s26  ;;  %p285_p11 = scmp.eq.s32.totalorder %s284_s27, 0 }
  0x1a   : > { %385 = sbr.rel (%p382_p10) target bundleno = 4581 (0x11e5), region = 60  ;;  %s3226_s30 = sand.u32 (!%p382_p10), 1, %s2670_s14  }
  0x1b   : > { %s2838_s29 = scalar_select %p285_p11, %s2674_s15, %s287_s28  }
  0x1c   : > { %p443_p12 = scmp.lt.s32.totalorder (!%p382_p10), %s2682_s17, 1  ;;  %s2844_s11 = sshll.u32 (!%p382_p10), %s3226_s30, 3 }
  0x1d   : > { %3254 = sst [smem:[#allocation17_spill]] %s2838_s29  ;;  %p454_p13 = scmp.lt.s32.totalorder (!%p382_p10), %s2678_s16, 1 }
  0x1e   : > { %s3255_s0 = sld [smem:[#allocation18_spill]] (!%p382_p10)  ;;  %p2177_p0 = scmp.ne.s32.totalorder (!%p382_p10), %s2678_s16, 0 }
  0x21   : > { %s2848_s12 = scalar_select %p443_p12, %s2682_s17, 1 }
  0x22   : > { %s2851_s21 = scalar_select %p454_p13, %s2678_s16, 1 }
  0x23   : > { %s2169_s22 = sshll.u32 %s2848_s12, 2  ;;  %476 = sbr.rel (%p2177_p0) target bundleno = 42 (0x2a), region = 64  ;;  %vm479_vm0 = vcmask (!%p2177_p0), 261120  }
  0x24   : > { %s446_s19 = scalar_lea.vmem %s3255_s0, %s2169_s22  ;;  %s2864_s15 = scalar_lea.vmem %s3215_s1, %s2169_s22 }
  0x25   : > { %s2233_s26 = sshll.u32 %s2851_s21, 5  ;;  %s2234_s13 = sshll.u32 %s2851_s21, 6  ;;  %v477_v0 = vld [vmem:[%s446_s19] sm:$0xf] (!%p2177_p0) }
  0x26   : > { %s2871_s25 = scalar_lea.vmem %s3218_s4, %s2233_s26  ;;  %s2876_s27 = scalar_lea.vmem %s3219_s5, %s2234_s13  ;;  %v478_v1 = vunpack.c.l.bf16 (!%p2177_p0), %v477_v0 }
  0x27   : > { %s2235_s28 = sshll.u32 %s2851_s21, 4  ;;  %s471_s24 = scalar_lea.vmem %s3221_s7, %s2851_s21 }
  0x28   : > { %s2886_s22 = scalar_lea.vmem %s3220_s6, %s2235_s28  ;;  %s442_s0 = scalar_lea.vmem [#allocation3], %s2844_s11  ;;  %480 = vst.msk [vmem:[#allocation2] sm:$0xff] (!%p2177_p0), %vm479_vm0, %v478_v1 }
  0x2a PF: > { %v2696_v2 = vmov 0.0   ;;  %v2892_v3 = vld [vmem:[%s2871_s25] ss:$8 sps:$4 sm:$0xff]   ;;  %vm2697_vm1 = vmmov 0   ;;  %v2897_v4 = vld [vmem:[%s2871_s25 + $0x10] ss:$8 sps:$4 sm:$0xff]  }
  0x2b   : > { %2294 = vmatprep.subr.bf16.mxu1 %v2696_v2  ;;  %2298 = vmatprep.mubr.msk.bf16.mxu1 %vm2697_vm1, %v2696_v2  ;;  %vm500_vm2 = vcmask 261120   ;;  %s2698_s10 = smov 120   ;;  %s2699_s13 = smov 96   ;;  %vm549_vm3 = vcmask 64512   ;;  %v544_v24 = vld [vmem:[%s3216_s2] sm:$0xff]  ;;  %vm615_vm4 = vcmask 1043456  }
  0x2c   : > { %2308 = vmatprep.subr.bf16.mxu0 %v2696_v2  ;;  %2310 = vmatprep.mubr.msk.bf16.mxu0 %vm2697_vm1, %v2696_v2  ;;  %s2700_s14 = smov 80   ;;  %s2701_s17 = smov 88   ;;  %vm1008_vm5 = vcmask 130048   ;;  %vm1010_vm6 = vcmask 195584   ;;  %vm1870_vm7 = vcmask 523264  }
  0x2d   : > { %2295 = vmatpush3.bf16.msra.mxu1 %v2892_v3  ;;  %s2702_s19 = smov 72   ;;  %s2703_s20 = smov 112  }
  0x2e   : > { %2296 = vmatprep.subr.bf16.mxu1 %v2696_v2  ;;  %s2704_s26 = smov 104   ;;  %s2705_s30 = smov 56  }
  0x2f   : > { %v2899_v5 = vld [vmem:[#allocation2] sm:$0xff]  ;;  %s2706_s18 = smov 64   ;;  %s2707_s29 = smov 40  }
  0x30   : > { %v483_v6 = vpack.c.bf16 %v2899_v5, %v2899_v5  ;;  %s2708_s28 = smov 48   ;;  %s2709_s23 = smov 8  }
  0x31   : > { %2297 = vmatpush3.bf16.msra.mxu1 %v2897_v4  ;;  %p2224_p1 = scmp.ne.s32.totalorder %s2678_s16, 1 }
  0x32   : > { %2302 = vmatprep.subr.bf16.mxu1 %v2696_v2  ;;  %vm2714_vm8 = vmmov (!%p2224_p1), 0  }
  0x34   : > { %2299 = vmatmul.mubr.msk.bf16.vlgmr.msra.gmra.mrb[0].mxu1 %vm500_vm2, %v483_v6 }
  0x35   : > { %2304 = vmatprep.mubr.msk.bf16.mxu1 %vm2697_vm1, %v2696_v2 }
 0x107   : > { %v538_v7 = vpop.f32.mrb[0].mxu1 }
 0x108   : > { %v2913_v8 = vpack.c.bf16 %v538_v7, %v538_v7  ;;  %v2300_v9 = vpop.f32.mrb[1].mxu1 }
 0x109   : > { %v541_v10 = vpop.f32.mrb[2].mxu1 }
 0x10a   : > { %659 = vrot.lane.b32.xlu1 %v2913_v8, %s2698_s10  ;;  %547 = vrot.lane.b32.xlu0 %v2913_v8, %s2699_s13  ;;  %v2301_v11 = vpop.f32.mrb[3].mxu1 }
 0x10e   : > { %773 = vrot.lane.b32.xlu1 %v2913_v8, %s2700_s14  ;;  %661 = vrot.lane.b32.xlu0 %v2913_v8, %s2701_s17 }
 0x112   : > { %885 = vrot.lane.b32.xlu1 %v2913_v8, %s2702_s19  ;;  %771 = vrot.lane.b32.xlu0 %v2913_v8, %s2703_s20 }
 0x116   : > { %883 = vrot.lane.b32.xlu0 %v2913_v8, %s2704_s26 }
 0x17c   : > { %v548_v12 = vpop.permute.xlu0 %547  ;;  %v660_v15 = vpop.permute.xlu1 %659 }
 0x17d   : > { %v554_v13 = vsel %vm549_vm3, %v548_v12, 0 }
 0x17e   : > { %2303 = vmatpush3.bf16.xpose.msra.mxu1 %v554_v13 }
 0x17f   : > { %2314 = vmatprep.subr.bf16.mxu1 %v2696_v2 }
 0x180   : > { %v662_v14 = vpop.permute.xlu0 %661  ;;  %v774_v17 = vpop.permute.xlu1 %773 }
 0x181   : > { %v667_v16 = vsel %vm549_vm3, %v662_v14, 0  ;;  %v779_v18 = vsel %vm549_vm3, %v774_v17, 0 }
 0x184   : > { %v886_v19 = vpop.permute.xlu1 %885  ;;  %v772_v20 = vpop.permute.xlu0 %771 }
 0x185   : > { %2305 = vmatmul.mubr.msk.bf16.vlgmr.msra.gmra.mrb[4].mxu1 %vm549_vm3, %v2913_v8  ;;  %v891_v21 = vsel %vm549_vm3, %v886_v19, 0 }
 0x186   : > { %2315 = vmatpush3.bf16.xpose.msra.mxu1 %v667_v16  ;;  %2316 = vmatprep.mubr.msk.bf16.mxu1 %vm2697_vm1, %v2696_v2 }
 0x187   : > { %2326 = vmatprep.subr.bf16.mxu1 %v2696_v2 }
 0x188   : > { %v884_v22 = vpop.permute.xlu0 %883 }
 0x18d   : > { %2317 = vmatmul.mubr.msk.bf16.vlgmr.msra.gmra.mrb[8].mxu1 %vm549_vm3, %v660_v15 }
 0x18e   : > { %2327 = vmatpush3.bf16.xpose.msra.mxu1 %v779_v18  ;;  %2328 = vmatprep.mubr.msk.bf16.mxu1 %vm2697_vm1, %v2696_v2 }
 0x18f   : > { %2338 = vmatprep.subr.bf16.mxu1 %v2696_v2 }
 0x195   : > { %2329 = vmatmul.mubr.msk.bf16.vlgmr.msra.gmra.mrb[12].mxu1 %vm549_vm3, %v772_v20 }
 0x196   : > { %2339 = vmatpush3.bf16.xpose.msra.mxu1 %v891_v21  ;;  %2340 = vmatprep.mubr.msk.bf16.mxu1 %vm2697_vm1, %v2696_v2 }
 0x197   : > { %2350 = vmatprep.subr.bf16.mxu1 %v2696_v2 }
 0x19d   : > { %2341 = vmatmul.mubr.msk.bf16.vlgmr.msra.gmra.mrb[16].mxu1 %vm549_vm3, %v884_v22 }
 0x19e   : > { %2354 = vmatprep.mubr.msk.bf16.mxu1 %vm2697_vm1, %v2696_v2 }
 0x258   : > { %v590_v23 = vpop.f32.mrb[4].mxu1 }
 0x259   : > { %v596_v25 = vmul.f32 0.17677669, %v590_v23  ;;  %v2306_v26 = vpop.f32.mrb[5].mxu1 }
 0x25a   : > { %v593_v27 = vpop.f32.mrb[6].mxu1 }
 0x25b   : > { %v2307_v28 = vpop.f32.mrb[7].mxu1  ;;  %v597_v29 = vadd.f32 %v596_v25, %v544_v24 }
 0x25d   : > { %v598_v30 = vsel %vm549_vm3, %v597_v29, -inf }
 0x25e   : > { %599 = vmax.xlane.f32.xlu1 %v598_v30 }
 0x260   : > { %v703_v31 = vpop.f32.mrb[8].mxu1 }
 0x261   : > { %v709_v32 = vmul.f32 0.17677669, %v703_v31  ;;  %v2318_v33 = vpop.f32.mrb[9].mxu1 }
 0x262   : > { %v706_v34 = vpop.f32.mrb[10].mxu1 }
 0x263   : > { %v2319_v35 = vpop.f32.mrb[11].mxu1  ;;  %v710_v36 = vadd.f32 %v709_v32, %v544_v24 }
 0x265   : > { %v711_v37 = vsel %vm549_vm3, %v710_v36, -inf }
 0x266   : > { %712 = vmax.xlane.f32.xlu0 %v711_v37 }
 0x268   : > { %v815_v38 = vpop.f32.mrb[12].mxu1 }
 0x269   : > { %v821_v39 = vmul.f32 0.17677669, %v815_v38  ;;  %v2330_v40 = vpop.f32.mrb[13].mxu1 }
 0x26a   : > { %v818_v41 = vpop.f32.mrb[14].mxu1 }
 0x26b   : > { %v2331_v42 = vpop.f32.mrb[15].mxu1  ;;  %v822_v43 = vadd.f32 %v821_v39, %v544_v24 }
 0x26d   : > { %v823_v44 = vsel %vm549_vm3, %v822_v43, -inf }
 0x26e   : > { %824 = vmax.xlane.f32.xlu0 %v823_v44  ;;  %v2550_v44 = vld [vmem:[%s2876_s27] sm:$0xff]  }
 0x26f   : > { %2351 = vmatpush3.bf16.msra.mxu1 %v2550_v44 }
 0x270   : > { %v927_v45 = vpop.f32.mrb[16].mxu1  ;;  %2352 = vmatprep.subr.bf16.mxu1 %v2696_v2 }
 0x271   : > { %v933_v46 = vmul.f32 0.17677669, %v927_v45  ;;  %v2342_v47 = vpop.f32.mrb[17].mxu1  ;;  %v2551_v45 = vld [vmem:[%s2876_s27 + $0x8] sm:$0xff]  }
 0x272   : > { %v930_v48 = vpop.f32.mrb[18].mxu1 }
 0x273   : > { %v2343_v49 = vpop.f32.mrb[19].mxu1  ;;  %v934_v50 = vadd.f32 %v933_v46, %v544_v24  ;;  %2353 = vmatpush3.bf16.msra.mxu1 %v2551_v45 }
 0x274   : > { %2366 = vmatprep.subr.bf16.mxu1 %v2696_v2 }
 0x275   : > { %v935_v51 = vsel %vm549_vm3, %v934_v50, -inf }
 0x276   : > { %936 = vmax.xlane.f32.xlu1 %v935_v51 }
 0x2eb   : > { %v600_v52 = vpop.xlane.xlu1 %599 }
 0x2ec   : > { %v601_v53 = vsub.f32 %v597_v29, %v600_v52 }
 0x2ee   : > { %v602_v54 = vmul.f32 1.442695, %v601_v53 }
 0x2f0   : > { %2560 = vpow2.f32 %v602_v54 }
 0x2f3   : > { %v713_v55 = vpop.xlane.xlu0 %712 }
 0x2f4   : > { %v714_v56 = vsub.f32 %v710_v36, %v713_v55 }
 0x2f6   : > { %v715_v57 = vmul.f32 1.442695, %v714_v56 }
 0x2f8   : > { %2562 = vpow2.f32 %v715_v57 }
 0x2fa   : > { %v2561_v58 = vpop.eup %2560 }
 0x2fb   : > { %v825_v59 = vpop.xlane.xlu0 %824  ;;  %v604_v60 = vsel %vm549_vm3, %v2561_v58, 0.0 }
 0x2fc   : > { %v826_v61 = vsub.f32 %v822_v43, %v825_v59  ;;  %605 = vadd.xlane.f32.xlu0 %v604_v60 }
 0x2fe   : > { %v827_v62 = vmul.f32 1.442695, %v826_v61  ;;  %v2189_v61 = vld [vmem:[%s2886_s22] ss:$0 sm:$0xff] }
 0x300   : > { %2564 = vpow2.f32 %v827_v62 }
 0x302   : > { %v2563_v63 = vpop.eup %2562 }
 0x303   : > { %v717_v0 = vsel %vm549_vm3, %v2563_v63, 0.0  ;;  %v937_v7 = vpop.xlane.xlu1 %936 }
 0x304   : > { %718 = vadd.xlane.f32.xlu1 %v717_v0  ;;  %v938_v9 = vsub.f32 %v934_v50, %v937_v7 }
 0x306   : > { %v939_v10 = vmul.f32 1.442695, %v938_v9 }
 0x308   : > { %2566 = vpow2.f32 %v939_v10 }
 0x30a   : > { %v2565_v1 = vpop.eup %2564 }
 0x30b   : > { %v829_v6 = vsel %vm549_vm3, %v2565_v1, 0.0 }
 0x30c   : > { %830 = vadd.xlane.f32.xlu0 %v829_v6 }
 0x312   : > { %v2567_v11 = vpop.eup %2566 }
 0x313   : > { %v941_v12 = vsel %vm549_vm3, %v2567_v11, 0.0 }
 0x315   : > { %723 = vrot.lane.b32.xlu1 %v2913_v8, %s2705_s30  ;;  %s2710_s30 = smov 16  }
 0x322   : > { %610 = vrot.lane.b32.xlu0 %v2913_v8, %s2706_s18 }
 0x326   : > { %947 = vrot.lane.b32.xlu0 %v2913_v8, %s2707_s29  ;;  %s2711_s29 = smov 24  }
 0x339   : > { %942 = vadd.xlane.f32.xlu1 %v941_v12 }
 0x34a   : > { %835 = vrot.lane.b32.xlu1 %v2913_v8, %s2708_s28  ;;  %s2712_s28 = smov 32  }
 0x389   : > { %v606_v13 = vpop.xlane.xlu0 %605 }
 0x38a   : > { %2568 = vrcp.f32 %v606_v13 }
 0x391   : > { %v719_v14 = vpop.xlane.xlu1 %718 }
 0x392   : > { %2570 = vrcp.f32 %v719_v14 }
 0x394   : > { %v2569_v15 = vpop.eup %2568 }
 0x395   : > { %v608_v17 = vmul.f32 %v2569_v15, %v2561_v58  ;;  %v724_v20 = vpop.permute.xlu1 %723  ;;  %v3005_v15 = vld [vmem:[%s2871_s25 + $0x4] ss:$8 sps:$4 sm:$0xff]  }
 0x396   : > { %v729_v23 = vsel %vm615_vm4, %v724_v20, 0 }
 0x397   : > { %v609_v21 = vpack.c.bf16 %v608_v17, %v608_v17 }
 0x399   : > { %v831_v16 = vpop.xlane.xlu0 %830 }
 0x39a   : > { %2572 = vrcp.f32 %v831_v16 }
 0x39c   : > { %v2571_v22 = vpop.eup %2570 }
 0x39d   : > { %v611_v18 = vpop.permute.xlu0 %610  ;;  %v721_v8 = vmul.f32 %v2571_v22, %v2563_v63 }
 0x39e   : > { %v617_v19 = vsel %vm615_vm4, %v611_v18, 0 }
 0x39f   : > { %2309 = vmatpush3.bf16.msra.mxu0 %v617_v19  ;;  %v722_v24 = vpack.c.bf16 %v721_v8, %v721_v8 }
 0x3a0   : > { %2320 = vmatprep.subr.bf16.mxu0 %v2696_v2 }
 0x3a1   : > { %v948_v30 = vpop.permute.xlu0 %947 }
 0x3a2   : > { %2311 = vmatmul.mubr.msk.bf16.vlgmr.msra.gmra.mrb[0].mxu0 %vm549_vm3, %v609_v21  ;;  %v953_v32 = vsel %vm615_vm4, %v948_v30, 0  ;;  %v2193_v21 = vld [vmem:[%s2886_s22 + $0x1] ss:$0 sm:$0xff] }
 0x3a3   : > { %2321 = vmatpush3.bf16.msra.mxu0 %v729_v23  ;;  %2322 = vmatprep.mubr.msk.bf16.mxu0 %vm2697_vm1, %v2696_v2  ;;  %v2194_v23 = vld [vmem:[%s2886_s22 + $0x2] ss:$0 sm:$0xff] }
 0x3a4   : > { %2332 = vmatprep.subr.bf16.mxu0 %v2696_v2  ;;  %v2573_v25 = vpop.eup %2572 }
 0x3a5   : > { %v833_v27 = vmul.f32 %v2573_v25, %v2565_v1 }
 0x3a7   : > { %v834_v31 = vpack.c.bf16 %v833_v27, %v833_v27 }
 0x3aa   : > { %2323 = vmatmul.mubr.msk.bf16.vlgmr.msra.gmra.mrb[4].mxu0 %vm549_vm3, %v722_v24 }
 0x3ab   : > { %2334 = vmatprep.mubr.msk.bf16.mxu0 %vm2697_vm1, %v2696_v2 }
 0x3c6   : > { %v943_v26 = vpop.xlane.xlu1 %942 }
 0x3c7   : > { %2574 = vrcp.f32 %v943_v26 }
 0x3ca   : > { %v836_v28 = vpop.permute.xlu1 %835 }
 0x3cb   : > { %v841_v29 = vsel %vm615_vm4, %v836_v28, 0 }
 0x3cc   : > { %2333 = vmatpush3.bf16.msra.mxu0 %v841_v29 }
 0x3cd   : > { %2344 = vmatprep.subr.bf16.mxu0 %v2696_v2 }
 0x3cf   : > { %2335 = vmatmul.mubr.msk.bf16.vlgmr.msra.gmra.mrb[8].mxu0 %vm549_vm3, %v834_v31 }
 0x3d0   : > { %2345 = vmatpush3.bf16.msra.mxu0 %v953_v32  ;;  %2346 = vmatprep.mubr.msk.bf16.mxu0 %vm2697_vm1, %v2696_v2 }
 0x3d1   : > { %v2575_v33 = vpop.eup %2574  ;;  %2358 = vmatprep.subr.bf16.mxu0 %v2696_v2 }
 0x3d2   : > { %v945_v34 = vmul.f32 %v2575_v33, %v2567_v11 }
 0x3d4   : > { %v946_v35 = vpack.c.bf16 %v945_v34, %v945_v34 }
 0x3d7   : > { %2347 = vmatmul.mubr.msk.bf16.vlgmr.msra.gmra.mrb[12].mxu0 %vm549_vm3, %v946_v35 }
 0x3d8   : > { %2362 = vmatprep.mubr.msk.bf16.mxu0 %vm2697_vm1, %v2696_v2 }
 0x475   : > { %v653_v36 = vpop.f32.mrb[0].mxu0 }
 0x476   : > { %v2312_v37 = vpop.f32.mrb[1].mxu0 }
 0x477   : > { %v656_v38 = vpop.f32.mrb[2].mxu0 }
 0x478   : > { %v2313_v39 = vpop.f32.mrb[3].mxu0 }
 0x47d   : > { %v765_v40 = vpop.f32.mrb[4].mxu0 }
 0x47e   : > { %996 = vrot.lane.b32.xlu1 %v765_v40, %s2709_s23  ;;  %v2324_v41 = vpop.f32.mrb[5].mxu0 }
 0x47f   : > { %v768_v42 = vpop.f32.mrb[6].mxu0 }
 0x480   : > { %v2325_v43 = vpop.f32.mrb[7].mxu0 }
 0x4a2   : > { %v877_v46 = vpop.f32.mrb[8].mxu0 }
 0x4a3   : > { %1000 = vrot.lane.b32.xlu0 %v877_v46, %s2710_s30  ;;  %v2336_v47 = vpop.f32.mrb[9].mxu0 }
 0x4a4   : > { %v880_v48 = vpop.f32.mrb[10].mxu0 }
 0x4a5   : > { %v2337_v49 = vpop.f32.mrb[11].mxu0 }
 0x4aa   : > { %v989_v50 = vpop.f32.mrb[12].mxu0 }
 0x4ab   : > { %1004 = vrot.lane.b32.xlu1 %v989_v50, %s2711_s29  ;;  %v2348_v51 = vpop.f32.mrb[13].mxu0 }
 0x4ac   : > { %v992_v52 = vpop.f32.mrb[14].mxu0 }
 0x4ad   : > { %v2349_v53 = vpop.f32.mrb[15].mxu0 }
 0x4f0   : > { %v997_v54 = vpop.permute.xlu1 %996 }
 0x4f1   : > { %v1007_v56 = vsel %vm549_vm3, %v653_v36, %v997_v54 }
 0x515   : > { %v1001_v55 = vpop.permute.xlu0 %1000 }
 0x516   : > { %v1009_v57 = vsel %vm1008_vm5, %v1007_v56, %v1001_v55 }
 0x51d   : > { %v1005_v58 = vpop.permute.xlu1 %1004 }
 0x51e   : > { %v1011_v59 = vsel %vm1010_vm6, %v1009_v57, %v1005_v58 }
 0x51f   : > { %v1012_v60 = vpack.c.bf16 %v1011_v59, %v1011_v59 }
 0x521   : > { %2355 = vmatmul.mubr.msk.bf16.vlgmr.msra.gmra.mrb[20].mxu1 %vm500_vm2, %v1012_v60 }
 0x522   : > { %2370 = vmatprep.mubr.msk.bf16.mxu1 %vm2697_vm1, %v2696_v2  ;;  %2367 = vmatpush3.bf16.msra.mxu1 %v3005_v15 }
 0x523   : > { %2368 = vmatprep.subr.bf16.mxu1 %v2696_v2 }
 0x5f4   : > { %v1071_v62 = vpop.f32.mrb[20].mxu1 }
 0x5f5   : > { %v1072_v63 = vadd.f32 %v2189_v61, %v1071_v62  ;;  %v2356_v0 = vpop.f32.mrb[21].mxu1 }
 0x5f6   : > { %v1074_v1 = vpop.f32.mrb[22].mxu1 }
 0x5f7   : > { %v2357_v6 = vpop.f32.mrb[23].mxu1  ;;  %v1077_v7 = vadd.f32 %v1072_v63, %v2899_v5  ;;  %v3010_v5 = vld [vmem:[%s2871_s25 + $0x14] ss:$8 sps:$4 sm:$0xff]  }
 0x5f8   : > { %2369 = vmatpush3.bf16.msra.mxu1 %v3010_v5 }
 0x5f9   : > { %v1080_v9 = vsel %vm500_vm2, %v1077_v7, 0.0  ;;  %2380 = vmatprep.subr.bf16.mxu1 %v2696_v2 }
 0x5fa   : > { %1081 = vadd.xlane.f32.xlu0 %v1080_v9 }
 0x610   : > { %1105 = vrot.lane.b32.xlu0 %v2892_v3, %s2712_s28  ;;  %v482_v3 = vld [vmem:[%s2864_s15] sm:$0xf] }
 0x611   : > { %2371 = vmatmul.mubr.msk.bf16.vlgmr.msra.gmra.mrb[24].mxu1 %vm500_vm2, %v482_v3 }
 0x612   : > { %2382 = vmatprep.mubr.msk.bf16.mxu1 %vm2697_vm1, %v2696_v2 }
 0x687   : > { %v1082_v10 = vpop.xlane.xlu0 %1081 }
 0x688   : > { %v1084_v11 = vmul.f32 0.03125, %v1082_v10 }
 0x68a   : > { %v1085_v12 = vsub.f32 %v1077_v7, %v1084_v11 }
 0x68b   : > { %v1106_v16 = vpop.permute.xlu0 %1105 }
 0x68c   : > { %v1086_v13 = vmul.f32 %v1085_v12, %v1085_v12  ;;  %2359 = vmatpush3.bf16.msra.mxu0 %v1106_v16 }
 0x68d   : > { %2360 = vmatprep.subr.bf16.mxu0 %v2696_v2 }
 0x68e   : > { %v1087_v14 = vsel %vm500_vm2, %v1086_v13, 0.0 }
 0x68f   : > { %1088 = vadd.xlane.f32.xlu1 %v1087_v14 }
 0x6a0   : > { %1107 = vrot.lane.b32.xlu1 %v2897_v4, %s2712_s28 }
 0x6e4   : > { %v1207_v26 = vpop.f32.mrb[24].mxu1 }
 0x6e5   : > { %v3030_v27 = vpack.c.bf16 %v1207_v26, %v1207_v26  ;;  %v2372_v28 = vpop.f32.mrb[25].mxu1 }
 0x6e6   : > { %v1210_v29 = vpop.f32.mrb[26].mxu1 }
 0x6e7   : > { %1334 = vrot.lane.b32.xlu0 %v3030_v27, %s2698_s10  ;;  %v2373_v30 = vpop.f32.mrb[27].mxu1  ;;  %v1220_v31 = vsel %vm549_vm3, %v3030_v27, 0 }
 0x6eb   : > { %1446 = vrot.lane.b32.xlu0 %v3030_v27, %s2703_s20 }
 0x6ef   : > { %1558 = vrot.lane.b32.xlu0 %v3030_v27, %s2704_s26 }
 0x71c   : > { %v1089_v17 = vpop.xlane.xlu1 %1088 }
 0x71d   : > { %v1090_v18 = vmul.f32 0.03125, %v1089_v17 }
 0x71f   : > { %v1091_v19 = vadd.f32 1e-05, %v1090_v18 }
 0x720   : > { %v1108_v4 = vpop.permute.xlu1 %1107 }
 0x721   : > { %2576 = vrsqrt.f32 %v1091_v19  ;;  %2361 = vmatpush3.bf16.msra.mxu0 %v1108_v4 }
 0x722   : > { %2374 = vmatprep.subr.bf16.mxu0 %v2696_v2 }
 0x72b   : > { %v2577_v20 = vpop.eup %2576 }
 0x72c   : > { %v1093_v22 = vmul.f32 %v2577_v20, %v1085_v12 }
 0x72e   : > { %v1098_v8 = vmul.f32 %v2193_v21, %v1093_v22 }
 0x730   : > { %v3023_v24 = vadd.f32 %v2194_v23, %v1098_v8 }
 0x732   : > { %v1104_v25 = vpack.c.bf16 %v3023_v24, %v3023_v24 }
 0x734   : > { %2363 = vmatmul.mubr.msk.bf16.vlgmr.msra.gmra.mrb[16].mxu0 %vm500_vm2, %v1104_v25 }
 0x735   : > { %2376 = vmatprep.mubr.msk.bf16.mxu0 %vm2697_vm1, %v2696_v2  ;;  %2375 = vmatpush3.bf16.xpose.msra.mxu0 %v1220_v31 }
 0x736   : > { %2386 = vmatprep.subr.bf16.mxu0 %v2696_v2 }
 0x759   : > { %v1335_v33 = vpop.permute.xlu0 %1334 }
 0x75a   : > { %v1340_v36 = vsel %vm549_vm3, %v1335_v33, 0 }
 0x75d   : > { %v1447_v39 = vpop.permute.xlu0 %1446 }
 0x75e   : > { %v1452_v41 = vsel %vm549_vm3, %v1447_v39, 0 }
 0x761   : > { %v1559_v42 = vpop.permute.xlu0 %1558 }
 0x762   : > { %v1564_v44 = vsel %vm549_vm3, %v1559_v42, 0 }
 0x807   : > { %v1148_v32 = vpop.f32.mrb[16].mxu0 }
 0x808   : > { %v1214_v34 = vpack.c.bf16 %v1148_v32, %v1148_v32  ;;  %v2364_v35 = vpop.f32.mrb[17].mxu0 }
 0x809   : > { %v1151_v37 = vpop.f32.mrb[18].mxu0 }
 0x80a   : > { %1332 = vrot.lane.b32.xlu1 %v1214_v34, %s2698_s10  ;;  %v2365_v38 = vpop.f32.mrb[19].mxu0  ;;  %2377 = vmatmul.mubr.msk.bf16.vlgmr.msra.gmra.mrb[20].mxu0 %vm549_vm3, %v1214_v34  ;;  %s3256_s10 = scalar_lea.vmem %s3217_s3, %s2848_s12 }
 0x80b   : > { %2387 = vmatpush3.bf16.xpose.msra.mxu0 %v1340_v36  ;;  %2388 = vmatprep.mubr.msk.bf16.mxu0 %vm2697_vm1, %v2696_v2  ;;  %v2200_v47 = vld [vmem:[%s3256_s10] ss:$0 sm:$0xff] }
 0x80c   : > { %2398 = vmatprep.subr.bf16.mxu0 %v2696_v2 }
 0x80e   : > { %1444 = vrot.lane.b32.xlu1 %v1214_v34, %s2703_s20 }
 0x812   : > { %1556 = vrot.lane.b32.xlu1 %v1214_v34, %s2704_s26 }
 0x87c   : > { %v1333_v40 = vpop.permute.xlu1 %1332 }
 0x87d   : > { %2389 = vmatmul.mubr.msk.bf16.vlgmr.msra.gmra.mrb[24].mxu0 %vm549_vm3, %v1333_v40 }
 0x87e   : > { %2399 = vmatpush3.bf16.xpose.msra.mxu0 %v1452_v41  ;;  %2400 = vmatprep.mubr.msk.bf16.mxu0 %vm2697_vm1, %v2696_v2 }
 0x87f   : > { %2410 = vmatprep.subr.bf16.mxu0 %v2696_v2 }
 0x880   : > { %v1445_v43 = vpop.permute.xlu1 %1444 }
 0x884   : > { %v1557_v45 = vpop.permute.xlu1 %1556 }
 0x885   : > { %2401 = vmatmul.mubr.msk.bf16.vlgmr.msra.gmra.mrb[28].mxu0 %vm549_vm3, %v1445_v43 }
 0x886   : > { %2411 = vmatpush3.bf16.xpose.msra.mxu0 %v1564_v44  ;;  %2412 = vmatprep.mubr.msk.bf16.mxu0 %vm2697_vm1, %v2696_v2 }
 0x887   : > { %2422 = vmatprep.subr.bf16.mxu0 %v2696_v2 }
 0x88d   : > { %2413 = vmatmul.mubr.msk.bf16.vlgmr.msra.gmra.mrb[32].mxu0 %vm549_vm3, %v1557_v45 }
 0x88e   : > { %2426 = vmatprep.mubr.msk.bf16.mxu0 %vm2697_vm1, %v2696_v2 }
 0x8dd   : > { %v1256_v46 = vpop.f32.mrb[20].mxu0 }
 0x8de   : > { %v1262_v48 = vmul.f32 0.17677669, %v1256_v46  ;;  %v2378_v49 = vpop.f32.mrb[21].mxu0 }
 0x8df   : > { %v1259_v50 = vpop.f32.mrb[22].mxu0 }
 0x8e0   : > { %v2379_v51 = vpop.f32.mrb[23].mxu0  ;;  %v1269_v52 = vadd.f32 %v2200_v47, %v1262_v48 }
 0x8e2   : > { %v1270_v53 = vsel %vm549_vm3, %v1269_v52, -inf }
 0x8e3   : > { %1271 = vmax.xlane.f32.xlu0 %v1270_v53 }
 0x950   : > { %v1376_v54 = vpop.f32.mrb[24].mxu0 }
 0x951   : > { %v1382_v55 = vmul.f32 0.17677669, %v1376_v54  ;;  %v2390_v56 = vpop.f32.mrb[25].mxu0 }
 0x952   : > { %v1379_v57 = vpop.f32.mrb[26].mxu0 }
 0x953   : > { %v2391_v58 = vpop.f32.mrb[27].mxu0  ;;  %v1383_v59 = vadd.f32 %v2200_v47, %v1382_v55 }
 0x955   : > { %v1384_v60 = vsel %vm549_vm3, %v1383_v59, -inf }
 0x956   : > { %1385 = vmax.xlane.f32.xlu1 %v1384_v60 }
 0x958   : > { %v1488_v61 = vpop.f32.mrb[28].mxu0 }
 0x959   : > { %v1494_v62 = vmul.f32 0.17677669, %v1488_v61  ;;  %v2402_v63 = vpop.f32.mrb[29].mxu0 }
 0x95a   : > { %v1491_v0 = vpop.f32.mrb[30].mxu0  ;;  %v2554_v63 = vld [vmem:[%s2876_s27 + $0x10] sm:$0xff]  }
 0x95b   : > { %v2403_v1 = vpop.f32.mrb[31].mxu0  ;;  %v1495_v6 = vadd.f32 %v2200_v47, %v1494_v62  ;;  %2423 = vmatpush3.bf16.msra.mxu0 %v2554_v63 }
 0x95c   : > { %2424 = vmatprep.subr.bf16.mxu0 %v2696_v2 }
 0x95d   : > { %v1496_v7 = vsel %vm549_vm3, %v1495_v6, -inf }
 0x95e   : > { %1497 = vmax.xlane.f32.xlu0 %v1496_v7 }
 0x960   : > { %v1600_v9 = vpop.f32.mrb[32].mxu0 }
 0x961   : > { %v1606_v10 = vmul.f32 0.17677669, %v1600_v9  ;;  %v2414_v11 = vpop.f32.mrb[33].mxu0  ;;  %v2555_v9 = vld [vmem:[%s2876_s27 + $0x18] sm:$0xff]  }
 0x962   : > { %v1603_v12 = vpop.f32.mrb[34].mxu0  ;;  %2425 = vmatpush3.bf16.msra.mxu0 %v2555_v9 }
 0x963   : > { %v2415_v13 = vpop.f32.mrb[35].mxu0  ;;  %v1607_v14 = vadd.f32 %v2200_v47, %v1606_v10  ;;  %2438 = vmatprep.subr.bf16.mxu0 %v2696_v2 }
 0x965   : > { %v1608_v3 = vsel %vm549_vm3, %v1607_v14, -inf }
 0x966   : > { %1609 = vmax.xlane.f32.xlu0 %v1608_v3 }
 0x970   : > { %v1272_v16 = vpop.xlane.xlu0 %1271 }
 0x971   : > { %v1273_v17 = vsub.f32 %v1269_v52, %v1272_v16 }
 0x973   : > { %v1274_v18 = vmul.f32 1.442695, %v1273_v17 }
 0x975   : > { %2578 = vpow2.f32 %v1274_v18 }
 0x97f   : > { %v2579_v19 = vpop.eup %2578 }
 0x980   : > { %v1276_v4 = vsel %vm549_vm3, %v2579_v19, 0.0 }
 0x981   : > { %1277 = vadd.xlane.f32.xlu1 %v1276_v4 }
 0x992   : > { %1283 = vrot.lane.b32.xlu1 %v3030_v27, %s2699_s13 }
 0x9e3   : > { %v1386_v20 = vpop.xlane.xlu1 %1385 }
 0x9e4   : > { %v1387_v21 = vsub.f32 %v1383_v59, %v1386_v20 }
 0x9e6   : > { %v1388_v22 = vmul.f32 1.442695, %v1387_v21 }
 0x9e8   : > { %2580 = vpow2.f32 %v1388_v22 }
 0x9eb   : > { %v1498_v23 = vpop.xlane.xlu0 %1497 }
 0x9ec   : > { %v1499_v8 = vsub.f32 %v1495_v6, %v1498_v23 }
 0x9ee   : > { %v1500_v25 = vmul.f32 1.442695, %v1499_v8  ;;  %v2208_v8 = vld [vmem:[%s2886_s22 + $0x3] ss:$0 sm:$0xff] }
 0x9f0   : > { %2582 = vpow2.f32 %v1500_v25 }
 0x9f2   : > { %v2581_v26 = vpop.eup %2580 }
 0x9f3   : > { %v1610_v28 = vpop.xlane.xlu0 %1609  ;;  %v1390_v29 = vsel %vm549_vm3, %v2581_v26, 0.0 }
 0x9f4   : > { %v1611_v30 = vsub.f32 %v1607_v14, %v1610_v28  ;;  %1391 = vadd.xlane.f32.xlu0 %v1390_v29 }
 0x9f6   : > { %v1612_v31 = vmul.f32 1.442695, %v1611_v30 }
 0x9f8   : > { %2584 = vpow2.f32 %v1612_v31 }
 0x9fa   : > { %v2583_v32 = vpop.eup %2582 }
 0x9fb   : > { %v1502_v33 = vsel %vm549_vm3, %v2583_v32, 0.0 }
 0x9fc   : > { %1503 = vadd.xlane.f32.xlu1 %v1502_v33 }
 0xa02   : > { %v2585_v34 = vpop.eup %2584 }
 0xa03   : > { %v1614_v35 = vsel %vm549_vm3, %v2585_v34, 0.0 }
 0xa04   : > { %1615 = vadd.xlane.f32.xlu0 %v1614_v35 }
 0xa0d   : > { %1508 = vrot.lane.b32.xlu1 %v3030_v27, %s2700_s14 }
 0xa0e   : > { %v1278_v36 = vpop.xlane.xlu1 %1277 }
 0xa0f   : > { %2586 = vrcp.f32 %v1278_v36 }
 0xa11   : > { %1620 = vrot.lane.b32.xlu1 %v3030_v27, %s2702_s19 }
 0xa12   : > { %v1284_v37 = vpop.permute.xlu1 %1283 }
 0xa13   : > { %v1289_v38 = vsel %vm615_vm4, %v1284_v37, 0 }
 0xa14   : > { %2381 = vmatpush3.bf16.msra.mxu1 %v1289_v38  ;;  %v2556_v38 = vld [vmem:[%s2876_s27 + $0x20] sm:$0xff]  }
 0xa15   : > { %2392 = vmatprep.subr.bf16.mxu1 %v2696_v2 }
 0xa19   : > { %v2587_v39 = vpop.eup %2586 }
 0xa1a   : > { %v1280_v40 = vmul.f32 %v2587_v39, %v2579_v19  ;;  %1396 = vrot.lane.b32.xlu0 %v3030_v27, %s2701_s17 }
 0xa1c   : > { %v1281_v41 = vpack.c.bf16 %v1280_v40, %v1280_v40 }
 0xa1e   : > { %2383 = vmatmul.mubr.msk.bf16.vlgmr.msra.gmra.mrb[28].mxu1 %vm549_vm3, %v1281_v41 }
 0xa1f   : > { %2394 = vmatprep.mubr.msk.bf16.mxu1 %vm2697_vm1, %v2696_v2 }
 0xa81   : > { %v1392_v42 = vpop.xlane.xlu0 %1391 }
 0xa82   : > { %2588 = vrcp.f32 %v1392_v42 }
 0xa89   : > { %v1504_v43 = vpop.xlane.xlu1 %1503 }
 0xa8a   : > { %2590 = vrcp.f32 %v1504_v43  ;;  %v2212_v43 = vld [vmem:[%s2886_s22 + $0x4] ss:$0 sm:$0xff] }
 0xa8c   : > { %v2589_v44 = vpop.eup %2588 }
 0xa8d   : > { %v1394_v46 = vmul.f32 %v2589_v44, %v2581_v26  ;;  %v1509_v49 = vpop.permute.xlu1 %1508 }
 0xa8e   : > { %v1514_v51 = vsel %vm615_vm4, %v1509_v49, 0  ;;  %v2558_v49 = vld [vmem:[%s2876_s27 + $0x30] sm:$0xff]  }
 0xa8f   : > { %v1395_v27 = vpack.c.bf16 %v1394_v46, %v1394_v46 }
 0xa91   : > { %v1616_v45 = vpop.xlane.xlu0 %1615  ;;  %v1621_v53 = vpop.permute.xlu1 %1620 }
 0xa92   : > { %2592 = vrcp.f32 %v1616_v45  ;;  %v1626_v56 = vsel %vm615_vm4, %v1621_v53, 0  ;;  %v2213_v45 = vld [vmem:[%s2886_s22 + $0x5] ss:$0 sm:$0xff] }
 0xa94   : > { %v2591_v50 = vpop.eup %2590 }
 0xa95   : > { %v1397_v47 = vpop.permute.xlu0 %1396  ;;  %v1506_v52 = vmul.f32 %v2591_v50, %v2583_v32  ;;  %v2214_v50 = vld [vmem:[%s471_s24] ss:$0 sm:$0xff] }
 0xa96   : > { %v1402_v48 = vsel %vm615_vm4, %v1397_v47, 0 }
 0xa97   : > { %2393 = vmatpush3.bf16.msra.mxu1 %v1402_v48  ;;  %v1507_v54 = vpack.c.bf16 %v1506_v52, %v1506_v52 }
 0xa98   : > { %2404 = vmatprep.subr.bf16.mxu1 %v2696_v2 }
 0xa9a   : > { %2395 = vmatmul.mubr.msk.bf16.vlgmr.msra.gmra.mrb[32].mxu1 %vm549_vm3, %v1395_v27  ;;  %v2559_v27 = vld [vmem:[%s2876_s27 + $0x38] sm:$0xff]  }
 0xa9b   : > { %2405 = vmatpush3.bf16.msra.mxu1 %v1514_v51  ;;  %2406 = vmatprep.mubr.msk.bf16.mxu1 %vm2697_vm1, %v2696_v2 }
 0xa9c   : > { %2416 = vmatprep.subr.bf16.mxu1 %v2696_v2  ;;  %v2593_v55 = vpop.eup %2592 }
 0xa9d   : > { %v1618_v57 = vmul.f32 %v2593_v55, %v2585_v34 }
 0xa9f   : > { %v1619_v58 = vpack.c.bf16 %v1618_v57, %v1618_v57 }
 0xaa2   : > { %2407 = vmatmul.mubr.msk.bf16.vlgmr.msra.gmra.mrb[36].mxu1 %vm549_vm3, %v1507_v54 }
 0xaa3   : > { %2417 = vmatpush3.bf16.msra.mxu1 %v1626_v56  ;;  %2418 = vmatprep.mubr.msk.bf16.mxu1 %vm2697_vm1, %v2696_v2 }
 0xaa4   : > { %2430 = vmatprep.subr.bf16.mxu1 %v2696_v2 }
 0xaaa   : > { %2419 = vmatmul.mubr.msk.bf16.vlgmr.msra.gmra.mrb[40].mxu1 %vm549_vm3, %v1619_v58  ;;  %v2216_v58 = vld [vmem:[%s2886_s22 + $0x6] ss:$0 sm:$0xff] }
 0xaab   : > { %2434 = vmatprep.mubr.msk.bf16.mxu1 %vm2697_vm1, %v2696_v2 }
 0xaf1   : > { %v1325_v59 = vpop.f32.mrb[28].mxu1 }
 0xaf2   : > { %v2384_v60 = vpop.f32.mrb[29].mxu1 }
 0xaf3   : > { %v1328_v61 = vpop.f32.mrb[30].mxu1 }
 0xaf4   : > { %v2385_v62 = vpop.f32.mrb[31].mxu1 }
 0xb6d   : > { %v1438_v0 = vpop.f32.mrb[32].mxu1 }
 0xb6e   : > { %1669 = vrot.lane.b32.xlu0 %v1438_v0, %s2709_s23  ;;  %v2396_v1 = vpop.f32.mrb[33].mxu1 }
 0xb6f   : > { %v1441_v6 = vpop.f32.mrb[34].mxu1 }
 0xb70   : > { %v2397_v7 = vpop.f32.mrb[35].mxu1 }
 0xb75   : > { %v1550_v10 = vpop.f32.mrb[36].mxu1 }
 0xb76   : > { %1673 = vrot.lane.b32.xlu1 %v1550_v10, %s2710_s30  ;;  %v2408_v11 = vpop.f32.mrb[37].mxu1 }
 0xb77   : > { %v1553_v12 = vpop.f32.mrb[38].mxu1 }
 0xb78   : > { %v2409_v13 = vpop.f32.mrb[39].mxu1 }
 0xb7d   : > { %v1662_v14 = vpop.f32.mrb[40].mxu1 }
 0xb7e   : > { %1677 = vrot.lane.b32.xlu0 %v1662_v14, %s2711_s29  ;;  %v2420_v3 = vpop.f32.mrb[41].mxu1 }
 0xb7f   : > { %v1665_v16 = vpop.f32.mrb[42].mxu1  ;;  %v2222_v3 = vld [vmem:[%s2886_s22 + $0x7] ss:$0 sm:$0xff] }
 0xb80   : > { %v2421_v17 = vpop.f32.mrb[43].mxu1 }
 0xb81   : > { %v2223_v17 = vld [vmem:[%s2886_s22 + $0x8] ss:$0 sm:$0xff] }
 0xbe0   : > { %v1670_v18 = vpop.permute.xlu0 %1669 }
 0xbe1   : > { %v1680_v4 = vsel %vm549_vm3, %v1325_v59, %v1670_v18 }
 0xbe8   : > { %v1674_v19 = vpop.permute.xlu1 %1673 }
 0xbe9   : > { %v1681_v20 = vsel %vm1008_vm5, %v1680_v4, %v1674_v19  ;;  %v2598_v4 = vld [vmem:[%s3222_s8] sm:$0xff] (!%p2224_p1)  }
 0xbf0   : > { %v1678_v21 = vpop.permute.xlu0 %1677 }
 0xbf1   : > { %v1682_v22 = vsel %vm1010_vm6, %v1681_v20, %v1678_v21  ;;  %v2713_v20 = vmov (!%p2224_p1), 0.0   ;;  %v2599_v21 = vld [vmem:[%s3222_s8 + $0x8] sm:$0xff] (!%p2224_p1)  }
 0xbf2   : > { %v1683_v23 = vpack.c.bf16 %v1682_v22, %v1682_v22 }
 0xbf4   : > { %2427 = vmatmul.mubr.msk.bf16.vlgmr.msra.gmra.mrb[36].mxu0 %vm500_vm2, %v1683_v23  ;;  %v2225_v23 = vld [vmem:[%s3223_s9] ss:$0 sm:$0xff] (!%p2224_p1) }
 0xbf5   : > { %2446 = vmatprep.mubr.msk.bf16.mxu0 %vm2697_vm1, %v2696_v2  ;;  %2439 = vmatpush3.bf16.msra.mxu0 %v2556_v38 }
 0xbf6   : > { %2440 = vmatprep.subr.bf16.mxu0 %v2696_v2 }
 0xcc7   : > { %v1742_v25 = vpop.f32.mrb[36].mxu0 }
 0xcc8   : > { %v1743_v26 = vadd.f32 %v2208_v8, %v1742_v25  ;;  %v2428_v28 = vpop.f32.mrb[37].mxu0 }
 0xcc9   : > { %v1745_v29 = vpop.f32.mrb[38].mxu0 }
 0xcca   : > { %v2429_v30 = vpop.f32.mrb[39].mxu0  ;;  %v1748_v31 = vadd.f32 %v1743_v26, %v3023_v24  ;;  %v2557_v24 = vld [vmem:[%s2876_s27 + $0x28] sm:$0xff]  }
 0xccb   : > { %2441 = vmatpush3.bf16.msra.mxu0 %v2557_v24 }
 0xccc   : > { %v1751_v32 = vsel %vm500_vm2, %v1748_v31, 0.0  ;;  %2442 = vmatprep.subr.bf16.mxu0 %v2696_v2 }
 0xccd   : > { %1752 = vadd.xlane.f32.xlu1 %v1751_v32 }
 0xccf   : > { %2443 = vmatpush3.bf16.msra.mxu0 %v2558_v49 }
 0xcd0   : > { %2444 = vmatprep.subr.bf16.mxu0 %v2696_v2 }
 0xcd3   : > { %2445 = vmatpush3.bf16.msra.mxu0 %v2559_v27 }
 0xcd4   : > { %2450 = vmatprep.subr.bf16.mxu0 (!%p2224_p1), %v2713_v20 }
 0xcde   : > { %1784 = vrot.lane.b32.xlu1 %v3010_v5, %s2706_s18 }
 0xd5a   : > { %v1753_v33 = vpop.xlane.xlu1 %1752 }
 0xd5b   : > { %v1754_v34 = vmul.f32 0.03125, %v1753_v33 }
 0xd5d   : > { %v1755_v35 = vsub.f32 %v1748_v31, %v1754_v34 }
 0xd5f   : > { %v1756_v36 = vmul.f32 %v1755_v35, %v1755_v35 }
 0xd61   : > { %v1757_v37 = vsel %vm500_vm2, %v1756_v36, 0.0 }
 0xd62   : > { %1758 = vadd.xlane.f32.xlu0 %v1757_v37 }
 0xd78   : > { %1782 = vrot.lane.b32.xlu0 %v3005_v15, %s2706_s18  ;;  %v1785_v15 = vpop.permute.xlu1 %1784 }
 0xdef   : > { %v1759_v5 = vpop.xlane.xlu0 %1758 }
 0xdf0   : > { %v1760_v39 = vmul.f32 0.03125, %v1759_v5 }
 0xdf2   : > { %v1761_v40 = vadd.f32 1e-05, %v1760_v39 }
 0xdf3   : > { %v1783_v41 = vpop.permute.xlu0 %1782 }
 0xdf4   : > { %2594 = vrsqrt.f32 %v1761_v40  ;;  %2431 = vmatpush3.bf16.msra.mxu1 %v1783_v41 }
 0xdf5   : > { %2432 = vmatprep.subr.bf16.mxu1 %v2696_v2 }
 0xdf8   : > { %2433 = vmatpush3.bf16.msra.mxu1 %v1785_v15 }
 0xdfe   : > { %v2595_v42 = vpop.eup %2594 }
 0xdff   : > { %v1763_v44 = vmul.f32 %v2595_v42, %v1755_v35 }
 0xe01   : > { %v1768_v46 = vmul.f32 %v2212_v43, %v1763_v44 }
 0xe03   : > { %v1773_v47 = vadd.f32 %v2213_v45, %v1768_v46 }
 0xe05   : > { %v1774_v48 = vpack.c.bf16 %v1773_v47, %v1773_v47 }
 0xe07   : > { %2435 = vmatmul.mubr.msk.bf16.vlgmr.msra.gmra.mrb[44].mxu1 %vm500_vm2, %v1774_v48 }
 0xeda   : > { %v1825_v51 = vpop.f32.mrb[44].mxu1 }
 0xedb   : > { %v1826_v52 = vadd.f32 %v2214_v50, %v1825_v51  ;;  %v2436_v53 = vpop.f32.mrb[45].mxu1 }
 0xedc   : > { %v1828_v54 = vpop.f32.mrb[46].mxu1 }
 0xedd   : > { %v1831_v55 = vmax.f32 %v1826_v52, 0.0  ;;  %v2437_v56 = vpop.f32.mrb[47].mxu1 }
 0xedf   : > { %v1832_v57 = vpack.c.bf16 %v1831_v55, %v1831_v55 }
 0xee1   : > { %2447 = vmatmul.mubr.msk.bf16.vlgmr.msra.gmra.mrb[40].mxu0 %vm1870_vm7, %v1832_v57 }
 0xee2   : > { %2451 = vmatpush3.bf16.msra.mxu0 (!%p2224_p1), %v2598_v4  ;;  %2454 = vmatprep.mubr.msk.bf16.mxu0 (!%p2224_p1), %vm2714_vm8, %v2713_v20 }
 0xee3   : > { %2452 = vmatprep.subr.bf16.mxu0 (!%p2224_p1), %v2713_v20 }
 0xee6   : > { %2453 = vmatpush3.bf16.msra.mxu0 (!%p2224_p1), %v2599_v21 }
 0xfb4   : > { %v1908_v59 = vpop.f32.mrb[40].mxu0 }
 0xfb5   : > { %v1909_v60 = vadd.f32 %v2216_v58, %v1908_v59  ;;  %v2448_v2 = vpop.f32.mrb[41].mxu0 }
 0xfb6   : > { %v1911_v61 = vpop.f32.mrb[42].mxu0 }
 0xfb7   : > { %v2449_v62 = vpop.f32.mrb[43].mxu0  ;;  %v1914_v63 = vadd.f32 %v1909_v60, %v1773_v47 }
 0xfb9   : > { %v1917_v0 = vsel %vm500_vm2, %v1914_v63, 0.0 }
 0xfba   : > { %1918 = vadd.xlane.f32.xlu1 %v1917_v0 }
0x1047   : > { %v1919_v1 = vpop.xlane.xlu1 %1918 }
0x1048   : > { %v1920_v6 = vmul.f32 0.03125, %v1919_v1 }
0x104a   : > { %v1921_v7 = vsub.f32 %v1914_v63, %v1920_v6 }
0x104c   : > { %v1922_v9 = vmul.f32 %v1921_v7, %v1921_v7 }
0x104e   : > { %v1923_v10 = vsel %vm500_vm2, %v1922_v9, 0.0 }
0x104f   : > { %1924 = vadd.xlane.f32.xlu0 %v1923_v10 }
0x10dc   : > { %v1925_v11 = vpop.xlane.xlu0 %1924 }
0x10dd   : > { %v1926_v12 = vmul.f32 0.03125, %v1925_v11 }
0x10df   : > { %v1927_v13 = vadd.f32 1e-05, %v1926_v12 }
0x10e1   : > { %2596 = vrsqrt.f32 %v1927_v13 }
0x10eb   : > { %v2597_v14 = vpop.eup %2596 }
0x10ec   : > { %v1929_v16 = vmul.f32 %v2597_v14, %v1921_v7  ;;  %1944 = sbr.rel (%p2224_p1) target bundleno = 4555 (0x11cb), region = 68 }
0x10ee   : > { %v1934_v18 = vmul.f32 %v2222_v3, %v1929_v16 }
0x10f0   : > { %v1939_v19 = vadd.f32 %v2223_v17, %v1934_v18 }
0x10f2   : > { %1940 = vst.msk [vmem:[#allocation2] sm:$0xff] %vm500_vm2, %v1939_v19  ;;  %v1945_v22 = vpack.c.bf16 (!%p2224_p1), %v1939_v19, %v1939_v19 }
0x10f4   : > { %2455 = vmatmul.mubr.msk.bf16.vlgmr.msra.gmra.mrb[0].mxu0 %vm500_vm2, %v1945_v22 }
0x11c7   : > { %v2006_v8 = vpop.f32.mrb[0].mxu0 }
0x11c8   : > { %v2007_v25 = vadd.f32 %v2225_v23, %v2006_v8  ;;  %v2456_v26 = vpop.f32.mrb[1].mxu0 }
0x11c9   : > { %v2009_v28 = vpop.f32.mrb[2].mxu0 }
0x11ca   : > { %2012 = vst [vmem:[%s442_s0] sm:$0xff] %v2007_v25  ;;  %v2457_v29 = vpop.f32.mrb[3].mxu0 }
0x11cb PF: > { %s3257_s17 = sld [smem:[#allocation9_spill]]  ;;  %s3260_s30 = sld [smem:[#allocation19_spill]] }
0x11cc   : > { %s3258_s19 = sld [smem:[#allocation7_spill]]  ;;  %s2027_s28 = sshll.u32 %s442_s0, 4  ;;  %s2028_s28 = int_to_ptr.vmem [resolvable:$true] %s2027_s28 }
0x11cd   : > { %s2600_s10 = scalar_lea.vmem %s2028_s28, 128  ;;  %s2715_s12 = smov [#allocation3]  }
0x11ce   : > { %p2601_p2 = scmp.ne.s32.totalorder %s2028_s28, %s2600_s10  ;;  %s2604_s13 = sshll.u32 %s2715_s12, 4  ;;  %s2605_s13 = int_to_ptr.vmem [resolvable:$false] %s2604_s13 }
0x11cf   : > { %s2606_s24 = scalar_lea.vmem %s2605_s13, 256  ;;  %p2607_p6 = scmp.lt.s32.totalorder %s2028_s28, %s2605_s13 }
0x11d0   : > { %p2602_p4 = pnand %p2601_p2, %p2820_p3  ;;  %p2608_p7 = scmp.lt.s32.totalorder %s2606_s24, %s2600_s10 }
0x11d1   : > { %s2230_s26 = sshll.u32 %s3257_s17, 7 }
0x11d2   : > { %s3163_s29 = scalar_lea.hbm %s3260_s30, %s2230_s26  ;;  %s3261_s15 = sand.u32 1, %s3258_s19  }
0x11d3   : > { %s2014_s25 = scalar_lea.sflag [#allocation4], %s3261_s15  ;;  %p2603_p5 = pneg %p2602_p4 }
0x11d4   : > { %p2609_p8 = por %p2608_p7, %p2607_p6 }
0x11d6   : > { %p2610_p10 = pnand %p2609_p8, %p2603_p5 }
0x11d8   : > { %2613 = shalt.err (!%p2610_p10)
}
0x11d9   : > { %s2614_s0 = scalar_lea.hbm %s3163_s29, 128  ;;  %s2618_s27 = scalar_lea.hbm %s3260_s30, 256 }
0x11da   : > { %p2615_p11 = scmp.ne.s32.totalorder %s3163_s29, %s2614_s0  ;;  %p2619_p0 = scmp.lt.u32.totalorder %s3163_s29, %s3260_s30 }
0x11db   : > { %p2620_p1 = scmp.lt.u32.totalorder %s2618_s27, %s2614_s0  ;;  %p2622_p4 = scmp.lt.u32.totalorder %s2614_s0, %s3163_s29 }
0x11dc   : > { %p2616_p12 = pnand %p2615_p11, %p2820_p3 }
0x11dd   : > { %p2621_p2 = por %p2620_p1, %p2619_p0 }
0x11de   : > { %p2617_p13 = pneg %p2616_p12 }
0x11df   : > { %p2623_p5 = por %p2622_p4, %p2621_p2 }
0x11e1   : > { %p2624_p6 = pnand %p2623_p5, %p2617_p13 }
0x11e3   : > { %2627 = shalt.err (!%p2624_p6)
}
0x11e4   : > { %2458 = dma.vmem_to_hbm [thread:$0]  (%p2820_p3), %s2028_s28, 128, %s3163_s29, %s2014_s25  }
0x11e5 PF: > { %s3262_s22 = sld [smem:[#allocation12_spill]]  ;;  %s3263_s17 = sld [smem:[#allocation6_spill]] }
0x11eb   : > { %p2464_p7 = scmp.ge.s32.totalorder %s3262_s22, 2  ;;  %s2039_s26 = sand.u32 1, %s3263_s17  }
0x11ec   : > { %s2040_s18 = scalar_lea.sflag [#allocation4], %s2039_s26 }
0x11ed   : > { %p2461_p8 = pnand %p2464_p7, %p2830_p9 }
0x11ef   : > { %2661 = dma.done.wait (!%p2461_p8), %s2040_s18, 128  }
0x11f0   : > { %2663 = vsyncadd (!%p2461_p8), %s2040_s18, 4294967168  ;;  %s23_s20 = sadd.s32 1, %s3262_s22   ;;  %s3265_s13 = sld [smem:[#allocation7_spill]] }
0x11f1   : > { %p20_p10 = scmp.ge.s32.totalorder %s23_s20, 6   ;;  %s3266_s14 = sld [smem:[#allocation8_spill]] }
0x11f2   : > { %s3267_s15 = sld [smem:[#allocation17_spill]]  ;;  %s3268_s16 = sld [smem:[#allocation10_spill]] }
0x11f3   : > { %s3269_s17 = sld [smem:[#allocation11_spill]]  ;;  %s3270_s18 = sld [smem:[#allocation13_spill]] }
0x11f4   : > { %s3271_s19 = sld [smem:[#allocation15_spill]]  ;;  %22 = sbr.rel (!%p20_p10) target bundleno = 8 (0x8), region = 121 }
0x11fb   :  { %2045 = vsyncpa [#allocation4], 1 }
0x11fc   :  { %2047 = vsyncpa [#allocation4 + $0x1], 1 }

</bundles_post_ra>
